<compile_context>
chip_gen: v7x
topology: tpu7x:2x2x1
jax: 0.10.0
libtpu: 0.0.40
codegen_flags: <defaults>
</compile_context>

<pallas_src>
import math

import jax
import jax.numpy as jnp
from jax.experimental import pallas as pl
from jax.experimental.pallas import tpu as pltpu

# ----------------------------- tiny BERT config ------------------------------
VOCAB = 100
TYPE_VOCAB = 2
MAX_POS = 16
HIDDEN = 32
NUM_HEADS = 2
HEAD_DIM = HIDDEN // NUM_HEADS
INTERMEDIATE = 64
NUM_LAYERS = 2
NUM_CLASSES = 3
LN_EPS = 1e-12
DROPOUT_RATE = 0.1  # eval-mode dropout == identity (see kernel tail)


# ------------------------------ fused Pallas kernel --------------------------


def _bert_fwd_kernel(
    emb_ref,        # [1, S, H]   summed embeddings for this batch element
    mask_ref,       # [1, 1, S]   attention mask (1 = keep, 0 = pad)
    emb_ln_g_ref,   # [1, H]
    emb_ln_b_ref,   # [1, H]
    qkv_w_ref,      # [L, H, 3H]  fused Q|K|V projection
    qkv_b_ref,      # [L, 1, 3H]
    ao_w_ref,       # [L, H, H]
    ao_b_ref,       # [L, 1, H]
    ln1_g_ref,      # [L, 1, H]
    ln1_b_ref,      # [L, 1, H]
    i_w_ref,        # [L, H, I]
    i_b_ref,        # [L, 1, I]
    o_w_ref,        # [L, I, H]
    o_b_ref,        # [L, 1, H]
    ln2_g_ref,      # [L, 1, H]
    ln2_b_ref,      # [L, 1, H]
    pool_w_ref,     # [H, H]
    pool_b_ref,     # [1, H]
    fc_w_ref,       # [H, C]
    fc_b_ref,       # [1, C]
    out_ref,        # [1, 1, C]
):
    scale = 1.0 / math.sqrt(HEAD_DIM)

    def layernorm(x, g, b):
        mean = jnp.mean(x, axis=-1, keepdims=True)
        cen = x - mean
        var = jnp.mean(cen * cen, axis=-1, keepdims=True)
        return cen * jax.lax.rsqrt(var + LN_EPS) * g + b

    def gelu(y):
        c = math.sqrt(2.0 / math.pi)
        return 0.5 * y * (1.0 + jnp.tanh(c * (y + 0.044715 * y * y * y)))

    # --- embeddings LayerNorm (no zero residual / extra DMA stream) ---
    x = layernorm(emb_ref[0], emb_ln_g_ref[...], emb_ln_b_ref[...])      # [S, H]

    # additive attention-mask bias: (1 - mask) * -1e4, broadcast over query dim
    bias = (1.0 - mask_ref[0]) * -10000.0                                # [1, S]

    # --- encoder layers; static loop, everything stays VMEM-resident ---
    for l in range(NUM_LAYERS):
        # fused Q|K|V projection: one MXU pass with N = 3H
        qkv = jnp.dot(x, qkv_w_ref[l],
                      preferred_element_type=jnp.float32) + qkv_b_ref[l]  # [S, 3H]

        ctx_heads = []
        for h in range(NUM_HEADS):      # static unroll: all heads in one kernel step
            lo = h * HEAD_DIM
            hi = lo + HEAD_DIM
            qh = qkv[:, lo:hi]                                          # [S, d]
            kh = qkv[:, HIDDEN + lo:HIDDEN + hi]                        # [S, d]
            vh = qkv[:, 2 * HIDDEN + lo:2 * HIDDEN + hi]                # [S, d]
            s = jnp.dot(qh, kh.T, preferred_element_type=jnp.float32) * scale + bias
            s = s - jnp.max(s, axis=-1, keepdims=True)
            p = jnp.exp(s)
            p = p * pl.reciprocal(jnp.sum(p, axis=-1, keepdims=True), approx=True)
            ctx_heads.append(jnp.dot(p, vh, preferred_element_type=jnp.float32))
        ctx = jnp.concatenate(ctx_heads, axis=-1)                        # [S, H]

        attn_out = jnp.dot(ctx, ao_w_ref[l],
                           preferred_element_type=jnp.float32) + ao_b_ref[l]
        x = layernorm(attn_out + x, ln1_g_ref[l], ln1_b_ref[l])

        ffn = gelu(jnp.dot(x, i_w_ref[l],
                           preferred_element_type=jnp.float32) + i_b_ref[l])
        ffn = jnp.dot(ffn, o_w_ref[l],
                      preferred_element_type=jnp.float32) + o_b_ref[l]
        x = layernorm(ffn + x, ln2_g_ref[l], ln2_b_ref[l])

    # --- pooler + classifier head (fused into the same kernel) ---
    # Computed over all S rows to keep MXU-friendly shapes; CLS row sliced out.
    pooled = jnp.tanh(jnp.dot(x, pool_w_ref[...],
                              preferred_element_type=jnp.float32) + pool_b_ref[...])
    # dropout: eval-mode (inference) => identity
    # TODO(synk): training-mode dropout would need pltpu.prng_random_bits masking.
    logits = jnp.dot(pooled, fc_w_ref[...],
                     preferred_element_type=jnp.float32) + fc_b_ref[...]  # [S, C]
    out_ref[0] = logits[0:1, :].astype(out_ref.dtype)                     # CLS row


# --------------------------- parameter construction --------------------------


def init_params(key):
    def nrm(k, shape, scale=0.02):
        return scale * jax.random.normal(k, shape, dtype=jnp.float32)

    keys = iter(jax.random.split(key, 64))
    p = {
        "word_emb": nrm(next(keys), (VOCAB, HIDDEN)),
        "pos_emb": nrm(next(keys), (MAX_POS, HIDDEN)),
        "type_emb": nrm(next(keys), (TYPE_VOCAB, HIDDEN)),
        "emb_ln_g": jnp.ones((HIDDEN,), jnp.float32),
        "emb_ln_b": jnp.zeros((HIDDEN,), jnp.float32),
        "pool_w": nrm(next(keys), (HIDDEN, HIDDEN)),
        "pool_b": jnp.zeros((HIDDEN,), jnp.float32),
        "fc_w": nrm(next(keys), (HIDDEN, NUM_CLASSES)),
        "fc_b": jnp.zeros((NUM_CLASSES,), jnp.float32),
    }

    stacks = {name: [] for name in
              ("qkv_w", "qkv_b", "ao_w", "ao_b", "ln1_g", "ln1_b",
               "i_w", "i_b", "o_w", "o_b", "ln2_g", "ln2_b")}
    for _ in range(NUM_LAYERS):
        qw = nrm(next(keys), (HIDDEN, HIDDEN))
        kw = nrm(next(keys), (HIDDEN, HIDDEN))
        vw = nrm(next(keys), (HIDDEN, HIDDEN))
        stacks["qkv_w"].append(jnp.concatenate([qw, kw, vw], axis=1))       # [H, 3H]
        stacks["qkv_b"].append(jnp.zeros((1, 3 * HIDDEN), jnp.float32))
        stacks["ao_w"].append(nrm(next(keys), (HIDDEN, HIDDEN)))
        stacks["ao_b"].append(jnp.zeros((1, HIDDEN), jnp.float32))
        stacks["ln1_g"].append(jnp.ones((1, HIDDEN), jnp.float32))
        stacks["ln1_b"].append(jnp.zeros((1, HIDDEN), jnp.float32))
        stacks["i_w"].append(nrm(next(keys), (HIDDEN, INTERMEDIATE)))
        stacks["i_b"].append(jnp.zeros((1, INTERMEDIATE), jnp.float32))
        stacks["o_w"].append(nrm(next(keys), (INTERMEDIATE, HIDDEN)))
        stacks["o_b"].append(jnp.zeros((1, HIDDEN), jnp.float32))
        stacks["ln2_g"].append(jnp.ones((1, HIDDEN), jnp.float32))
        stacks["ln2_b"].append(jnp.zeros((1, HIDDEN), jnp.float32))
    p.update({name: jnp.stack(lst) for name, lst in stacks.items()})
    return p


# -------------------------------- forward pass --------------------------------


def model_forward(params, x):
    """x mirrors the PyTorch tuple: x[0]=context ids [B,S], x[2]=attention mask [B,S]."""
    context = x[0]
    mask = x[2]
    B, S = context.shape

    # --- embedding gather + sum (glue; the LayerNorm runs inside the kernel) ---
    tok = jnp.take(params["word_emb"], context, axis=0)                 # [B, S, H]
    pos = params["pos_emb"][:S][None, :, :]                             # [1, S, H]
    typ = params["type_emb"][0][None, None, :]                          # [1, 1, H]
    emb = (tok + pos + typ).astype(jnp.float32)                         # [B, S, H]

    mask_f = mask.astype(jnp.float32).reshape(B, 1, S)                  # [B, 1, S]

    weight_args = [
        params["emb_ln_g"].reshape(1, HIDDEN),
        params["emb_ln_b"].reshape(1, HIDDEN),
        params["qkv_w"], params["qkv_b"],
        params["ao_w"], params["ao_b"],
        params["ln1_g"], params["ln1_b"],
        params["i_w"], params["i_b"],
        params["o_w"], params["o_b"],
        params["ln2_g"], params["ln2_b"],
        params["pool_w"], params["pool_b"].reshape(1, HIDDEN),
        params["fc_w"], params["fc_b"].reshape(1, NUM_CLASSES),
    ]

    def full_spec(shape):
        zeros = (0,) * len(shape)
        return pl.BlockSpec(shape, lambda b, _z=zeros: _z)  # same block every step

    in_specs = [
        pl.BlockSpec((1, S, HIDDEN), lambda b: (b, 0, 0)),   # emb, per-batch tile
        pl.BlockSpec((1, 1, S), lambda b: (b, 0, 0)),        # mask, per-batch tile
    ] + [full_spec(w.shape) for w in weight_args]

    out = pl.pallas_call(
        _bert_fwd_kernel,
        out_shape=jax.ShapeDtypeStruct((B, 1, NUM_CLASSES), jnp.float32),
        grid=(B,),
        in_specs=in_specs,
        out_specs=pl.BlockSpec((1, 1, NUM_CLASSES), lambda b: (b, 0, 0)),
        compiler_params=pltpu.CompilerParams(dimension_semantics=("parallel",)),
    )(emb, mask_f, *weight_args)

    return out.reshape(B, NUM_CLASSES)


# ----------------------------------- main -------------------------------------

if __name__ == "__main__":
    key = jax.random.PRNGKey(0)
    k_param, k_ids, k_len = jax.random.split(key, 3)

    B, S = 2, 8
    params = init_params(k_param)

    context = jax.random.randint(k_ids, (B, S), 0, VOCAB, dtype=jnp.int32)
    # mask: first row fully valid, second row has last 3 positions padded
    mask = jnp.array([[1] * S, [1] * (S - 3) + [0] * 3], dtype=jnp.int32)
    seq_len = jnp.array([S, S - 3], dtype=jnp.int32)  # x[1] in the torch tuple (unused)

    x = (context, seq_len, mask)
    logits = model_forward(params, x)
    logits = jax.block_until_ready(logits)

    assert logits.shape == (B, NUM_CLASSES), logits.shape
    assert jnp.all(jnp.isfinite(logits))
    print("KERNEL_OK")
</pallas_src>

<mosaic_0001>
module attributes {stable_mosaic.version = 11 : i64} {
  func.func @_bert_fwd_kernel(%arg0: i32, %arg1: memref<1x8x32xf32, #tpu.memory_space<vmem>>, %arg2: memref<1x1x8xf32, #tpu.memory_space<vmem>>, %arg3: memref<1x32xf32, #tpu.memory_space<vmem>>, %arg4: memref<1x32xf32, #tpu.memory_space<vmem>>, %arg5: memref<2x32x96xf32, #tpu.memory_space<vmem>>, %arg6: memref<2x1x96xf32, #tpu.memory_space<vmem>>, %arg7: memref<2x32x32xf32, #tpu.memory_space<vmem>>, %arg8: memref<2x1x32xf32, #tpu.memory_space<vmem>>, %arg9: memref<2x1x32xf32, #tpu.memory_space<vmem>>, %arg10: memref<2x1x32xf32, #tpu.memory_space<vmem>>, %arg11: memref<2x32x64xf32, #tpu.memory_space<vmem>>, %arg12: memref<2x1x64xf32, #tpu.memory_space<vmem>>, %arg13: memref<2x64x32xf32, #tpu.memory_space<vmem>>, %arg14: memref<2x1x32xf32, #tpu.memory_space<vmem>>, %arg15: memref<2x1x32xf32, #tpu.memory_space<vmem>>, %arg16: memref<2x1x32xf32, #tpu.memory_space<vmem>>, %arg17: memref<32x32xf32, #tpu.memory_space<vmem>>, %arg18: memref<1x32xf32, #tpu.memory_space<vmem>>, %arg19: memref<32x3xf32, #tpu.memory_space<vmem>>, %arg20: memref<1x3xf32, #tpu.memory_space<vmem>>, %arg21: memref<1x1x3xf32, #tpu.memory_space<vmem>>) attributes {dimension_semantics = [#tpu.dimension_semantics<parallel>], iteration_bounds = array<i64: 2>, scalar_prefetch = 0 : i64, scratch_operands = 0 : i64, tpu.core_type = #tpu.core_type<tc>, window_params = [{transform_indices = @transform_0, window_bounds = array<i64: 1, 8, 32>}, {transform_indices = @transform_1, window_bounds = array<i64: 1, 1, 8>}, {pipeline_mode = #tpu.pipeline_mode<synchronous>, transform_indices = @transform_2, window_bounds = array<i64: 1, 32>}, {pipeline_mode = #tpu.pipeline_mode<synchronous>, transform_indices = @transform_3, window_bounds = array<i64: 1, 32>}, {pipeline_mode = #tpu.pipeline_mode<synchronous>, transform_indices = @transform_4, window_bounds = array<i64: 2, 32, 96>}, {pipeline_mode = #tpu.pipeline_mode<synchronous>, transform_indices = @transform_5, window_bounds = array<i64: 2, 1, 96>}, {pipeline_mode = #tpu.pipeline_mode<synchronous>, transform_indices = @transform_6, window_bounds = array<i64: 2, 32, 32>}, {pipeline_mode = #tpu.pipeline_mode<synchronous>, transform_indices = @transform_7, window_bounds = array<i64: 2, 1, 32>}, {pipeline_mode = #tpu.pipeline_mode<synchronous>, transform_indices = @transform_8, window_bounds = array<i64: 2, 1, 32>}, {pipeline_mode = #tpu.pipeline_mode<synchronous>, transform_indices = @transform_9, window_bounds = array<i64: 2, 1, 32>}, {pipeline_mode = #tpu.pipeline_mode<synchronous>, transform_indices = @transform_10, window_bounds = array<i64: 2, 32, 64>}, {pipeline_mode = #tpu.pipeline_mode<synchronous>, transform_indices = @transform_11, window_bounds = array<i64: 2, 1, 64>}, {pipeline_mode = #tpu.pipeline_mode<synchronous>, transform_indices = @transform_12, window_bounds = array<i64: 2, 64, 32>}, {pipeline_mode = #tpu.pipeline_mode<synchronous>, transform_indices = @transform_13, window_bounds = array<i64: 2, 1, 32>}, {pipeline_mode = #tpu.pipeline_mode<synchronous>, transform_indices = @transform_14, window_bounds = array<i64: 2, 1, 32>}, {pipeline_mode = #tpu.pipeline_mode<synchronous>, transform_indices = @transform_15, window_bounds = array<i64: 2, 1, 32>}, {pipeline_mode = #tpu.pipeline_mode<synchronous>, transform_indices = @transform_16, window_bounds = array<i64: 32, 32>}, {pipeline_mode = #tpu.pipeline_mode<synchronous>, transform_indices = @transform_17, window_bounds = array<i64: 1, 32>}, {pipeline_mode = #tpu.pipeline_mode<synchronous>, transform_indices = @transform_18, window_bounds = array<i64: 32, 3>}, {pipeline_mode = #tpu.pipeline_mode<synchronous>, transform_indices = @transform_19, window_bounds = array<i64: 1, 3>}, {transform_indices = @transform_20, window_bounds = array<i64: 1, 1, 3>}]} {
    %c0 = arith.constant 0 : index
    %c0_0 = arith.constant 0 : index
    %c0_1 = arith.constant 0 : index
    %0 = vector.load %arg1[%c0, %c0_0, %c0_1] : memref<1x8x32xf32, #tpu.memory_space<vmem>>, vector<1x8x32xf32>
    %1 = vector.shape_cast %0 : vector<1x8x32xf32> to vector<8x32xf32>
    %c0_2 = arith.constant 0 : index
    %c0_3 = arith.constant 0 : index
    %2 = vector.load %arg3[%c0_2, %c0_3] : memref<1x32xf32, #tpu.memory_space<vmem>>, vector<1x32xf32>
    %c0_4 = arith.constant 0 : index
    %c0_5 = arith.constant 0 : index
    %3 = vector.load %arg4[%c0_4, %c0_5] : memref<1x32xf32, #tpu.memory_space<vmem>>, vector<1x32xf32>
    %cst = arith.constant dense<0.000000e+00> : vector<8xf32>
    %4 = vector.multi_reduction <add>, %1, %cst [1] : vector<8x32xf32> to vector<8xf32>
    %5 = vector.shape_cast %4 : vector<8xf32> to vector<8x1xf32>
    %cst_6 = arith.constant 3.200000e+01 : f32
    %6 = vector.broadcast %cst_6 : f32 to vector<8x1xf32>
    %7 = arith.divf %5, %6 : vector<8x1xf32>
    %8 = vector.broadcast %7 : vector<8x1xf32> to vector<8x32xf32>
    %9 = arith.subf %1, %8 : vector<8x32xf32>
    %10 = arith.mulf %9, %9 : vector<8x32xf32>
    %cst_7 = arith.constant dense<0.000000e+00> : vector<8xf32>
    %11 = vector.multi_reduction <add>, %10, %cst_7 [1] : vector<8x32xf32> to vector<8xf32>
    %12 = vector.shape_cast %11 : vector<8xf32> to vector<8x1xf32>
    %cst_8 = arith.constant 3.200000e+01 : f32
    %13 = vector.broadcast %cst_8 : f32 to vector<8x1xf32>
    %14 = arith.divf %12, %13 : vector<8x1xf32>
    %cst_9 = arith.constant 9.99999996E-13 : f32
    %15 = vector.broadcast %cst_9 : f32 to vector<8x1xf32>
    %16 = arith.addf %14, %15 : vector<8x1xf32>
    %17 = math.rsqrt %16 : vector<8x1xf32>
    %18 = vector.broadcast %17 : vector<8x1xf32> to vector<8x32xf32>
    %19 = arith.mulf %9, %18 : vector<8x32xf32>
    %20 = vector.broadcast %2 : vector<1x32xf32> to vector<8x32xf32>
    %21 = arith.mulf %19, %20 : vector<8x32xf32>
    %22 = vector.broadcast %3 : vector<1x32xf32> to vector<8x32xf32>
    %23 = arith.addf %21, %22 : vector<8x32xf32>
    %c0_10 = arith.constant 0 : index
    %c0_11 = arith.constant 0 : index
    %c0_12 = arith.constant 0 : index
    %24 = vector.load %arg2[%c0_10, %c0_11, %c0_12] : memref<1x1x8xf32, #tpu.memory_space<vmem>>, vector<1x1x8xf32>
    %25 = vector.shape_cast %24 : vector<1x1x8xf32> to vector<1x8xf32>
    %cst_13 = arith.constant 1.000000e+00 : f32
    %26 = vector.broadcast %cst_13 : f32 to vector<1x8xf32>
    %27 = arith.subf %26, %25 : vector<1x8xf32>
    %cst_14 = arith.constant -1.000000e+04 : f32
    %28 = vector.broadcast %cst_14 : f32 to vector<1x8xf32>
    %29 = arith.mulf %27, %28 : vector<1x8xf32>
    %c0_15 = arith.constant 0 : index
    %c0_16 = arith.constant 0 : index
    %c0_17 = arith.constant 0 : index
    %30 = vector.load %arg5[%c0_15, %c0_16, %c0_17] : memref<2x32x96xf32, #tpu.memory_space<vmem>>, vector<1x32x96xf32>
    %31 = vector.shape_cast %30 : vector<1x32x96xf32> to vector<32x96xf32>
    %cst_18 = arith.constant dense<0.000000e+00> : vector<8x96xf32>
    %32 = tpu.matmul %23, %31, %cst_18 {dimension_numbers = #tpu.dot_dimension_numbers<[1], [0], [0], [1], [0, 0, 1, 1], [], []>} : vector<8x32xf32>, vector<32x96xf32>, vector<8x96xf32> -> vector<8x96xf32>
    %c0_19 = arith.constant 0 : index
    %c0_20 = arith.constant 0 : index
    %c0_21 = arith.constant 0 : index
    %33 = vector.load %arg6[%c0_19, %c0_20, %c0_21] : memref<2x1x96xf32, #tpu.memory_space<vmem>>, vector<1x1x96xf32>
    %34 = vector.shape_cast %33 : vector<1x1x96xf32> to vector<1x96xf32>
    %35 = vector.broadcast %34 : vector<1x96xf32> to vector<8x96xf32>
    %36 = arith.addf %32, %35 : vector<8x96xf32>
    %37 = vector.extract_strided_slice %36 {offsets = [0, 0], sizes = [8, 16], strides = [1, 1]} : vector<8x96xf32> to vector<8x16xf32>
    %38 = vector.extract_strided_slice %36 {offsets = [0, 32], sizes = [8, 16], strides = [1, 1]} : vector<8x96xf32> to vector<8x16xf32>
    %39 = vector.extract_strided_slice %36 {offsets = [0, 64], sizes = [8, 16], strides = [1, 1]} : vector<8x96xf32> to vector<8x16xf32>
    %40 = tpu.transpose %38, [1, 0] : vector<8x16xf32> -> vector<16x8xf32>
    %cst_22 = arith.constant dense<0.000000e+00> : vector<8x8xf32>
    %41 = tpu.matmul %37, %40, %cst_22 {dimension_numbers = #tpu.dot_dimension_numbers<[1], [0], [0], [1], [0, 0, 1, 1], [], []>} : vector<8x16xf32>, vector<16x8xf32>, vector<8x8xf32> -> vector<8x8xf32>
    %cst_23 = arith.constant 2.500000e-01 : f32
    %42 = vector.broadcast %cst_23 : f32 to vector<8x8xf32>
    %43 = arith.mulf %41, %42 : vector<8x8xf32>
    %44 = vector.broadcast %29 : vector<1x8xf32> to vector<8x8xf32>
    %45 = arith.addf %43, %44 : vector<8x8xf32>
    %cst_24 = arith.constant dense<0xFF800000> : vector<8xf32>
    %46 = vector.multi_reduction <maximumf>, %45, %cst_24 [1] : vector<8x8xf32> to vector<8xf32>
    %47 = vector.shape_cast %46 : vector<8xf32> to vector<8x1xf32>
    %48 = vector.broadcast %47 : vector<8x1xf32> to vector<8x8xf32>
    %49 = arith.subf %45, %48 : vector<8x8xf32>
    %50 = math.exp %49 : vector<8x8xf32>
    %cst_25 = arith.constant dense<0.000000e+00> : vector<8xf32>
    %51 = vector.multi_reduction <add>, %50, %cst_25 [1] : vector<8x8xf32> to vector<8xf32>
    %52 = vector.shape_cast %51 : vector<8xf32> to vector<8x1xf32>
    %53 = tpu.reciprocal %52 {approx = true} : vector<8x1xf32> -> vector<8x1xf32>
    %54 = vector.broadcast %53 : vector<8x1xf32> to vector<8x8xf32>
    %55 = arith.mulf %50, %54 : vector<8x8xf32>
    %cst_26 = arith.constant dense<0.000000e+00> : vector<8x16xf32>
    %56 = tpu.matmul %55, %39, %cst_26 {dimension_numbers = #tpu.dot_dimension_numbers<[1], [0], [0], [1], [0, 0, 1, 1], [], []>} : vector<8x8xf32>, vector<8x16xf32>, vector<8x16xf32> -> vector<8x16xf32>
    %57 = vector.extract_strided_slice %36 {offsets = [0, 16], sizes = [8, 16], strides = [1, 1]} : vector<8x96xf32> to vector<8x16xf32>
    %58 = vector.extract_strided_slice %36 {offsets = [0, 48], sizes = [8, 16], strides = [1, 1]} : vector<8x96xf32> to vector<8x16xf32>
    %59 = vector.extract_strided_slice %36 {offsets = [0, 80], sizes = [8, 16], strides = [1, 1]} : vector<8x96xf32> to vector<8x16xf32>
    %60 = tpu.transpose %58, [1, 0] : vector<8x16xf32> -> vector<16x8xf32>
    %cst_27 = arith.constant dense<0.000000e+00> : vector<8x8xf32>
    %61 = tpu.matmul %57, %60, %cst_27 {dimension_numbers = #tpu.dot_dimension_numbers<[1], [0], [0], [1], [0, 0, 1, 1], [], []>} : vector<8x16xf32>, vector<16x8xf32>, vector<8x8xf32> -> vector<8x8xf32>
    %cst_28 = arith.constant 2.500000e-01 : f32
    %62 = vector.broadcast %cst_28 : f32 to vector<8x8xf32>
    %63 = arith.mulf %61, %62 : vector<8x8xf32>
    %64 = vector.broadcast %29 : vector<1x8xf32> to vector<8x8xf32>
    %65 = arith.addf %63, %64 : vector<8x8xf32>
    %cst_29 = arith.constant dense<0xFF800000> : vector<8xf32>
    %66 = vector.multi_reduction <maximumf>, %65, %cst_29 [1] : vector<8x8xf32> to vector<8xf32>
    %67 = vector.shape_cast %66 : vector<8xf32> to vector<8x1xf32>
    %68 = vector.broadcast %67 : vector<8x1xf32> to vector<8x8xf32>
    %69 = arith.subf %65, %68 : vector<8x8xf32>
    %70 = math.exp %69 : vector<8x8xf32>
    %cst_30 = arith.constant dense<0.000000e+00> : vector<8xf32>
    %71 = vector.multi_reduction <add>, %70, %cst_30 [1] : vector<8x8xf32> to vector<8xf32>
    %72 = vector.shape_cast %71 : vector<8xf32> to vector<8x1xf32>
    %73 = tpu.reciprocal %72 {approx = true} : vector<8x1xf32> -> vector<8x1xf32>
    %74 = vector.broadcast %73 : vector<8x1xf32> to vector<8x8xf32>
    %75 = arith.mulf %70, %74 : vector<8x8xf32>
    %cst_31 = arith.constant dense<0.000000e+00> : vector<8x16xf32>
    %76 = tpu.matmul %75, %59, %cst_31 {dimension_numbers = #tpu.dot_dimension_numbers<[1], [0], [0], [1], [0, 0, 1, 1], [], []>} : vector<8x8xf32>, vector<8x16xf32>, vector<8x16xf32> -> vector<8x16xf32>
    %77 = tpu.concatenate %56, %76 in 1 : vector<8x16xf32>, vector<8x16xf32> -> vector<8x32xf32>
    %c0_32 = arith.constant 0 : index
    %c0_33 = arith.constant 0 : index
    %c0_34 = arith.constant 0 : index
    %78 = vector.load %arg7[%c0_32, %c0_33, %c0_34] : memref<2x32x32xf32, #tpu.memory_space<vmem>>, vector<1x32x32xf32>
    %79 = vector.shape_cast %78 : vector<1x32x32xf32> to vector<32x32xf32>
    %cst_35 = arith.constant dense<0.000000e+00> : vector<8x32xf32>
    %80 = tpu.matmul %77, %79, %cst_35 {dimension_numbers = #tpu.dot_dimension_numbers<[1], [0], [0], [1], [0, 0, 1, 1], [], []>} : vector<8x32xf32>, vector<32x32xf32>, vector<8x32xf32> -> vector<8x32xf32>
    %c0_36 = arith.constant 0 : index
    %c0_37 = arith.constant 0 : index
    %c0_38 = arith.constant 0 : index
    %81 = vector.load %arg8[%c0_36, %c0_37, %c0_38] : memref<2x1x32xf32, #tpu.memory_space<vmem>>, vector<1x1x32xf32>
    %82 = vector.shape_cast %81 : vector<1x1x32xf32> to vector<1x32xf32>
    %83 = vector.broadcast %82 : vector<1x32xf32> to vector<8x32xf32>
    %84 = arith.addf %80, %83 : vector<8x32xf32>
    %85 = arith.addf %84, %23 : vector<8x32xf32>
    %c0_39 = arith.constant 0 : index
    %c0_40 = arith.constant 0 : index
    %c0_41 = arith.constant 0 : index
    %86 = vector.load %arg9[%c0_39, %c0_40, %c0_41] : memref<2x1x32xf32, #tpu.memory_space<vmem>>, vector<1x1x32xf32>
    %87 = vector.shape_cast %86 : vector<1x1x32xf32> to vector<1x32xf32>
    %c0_42 = arith.constant 0 : index
    %c0_43 = arith.constant 0 : index
    %c0_44 = arith.constant 0 : index
    %88 = vector.load %arg10[%c0_42, %c0_43, %c0_44] : memref<2x1x32xf32, #tpu.memory_space<vmem>>, vector<1x1x32xf32>
    %89 = vector.shape_cast %88 : vector<1x1x32xf32> to vector<1x32xf32>
    %cst_45 = arith.constant dense<0.000000e+00> : vector<8xf32>
    %90 = vector.multi_reduction <add>, %85, %cst_45 [1] : vector<8x32xf32> to vector<8xf32>
    %91 = vector.shape_cast %90 : vector<8xf32> to vector<8x1xf32>
    %cst_46 = arith.constant 3.200000e+01 : f32
    %92 = vector.broadcast %cst_46 : f32 to vector<8x1xf32>
    %93 = arith.divf %91, %92 : vector<8x1xf32>
    %94 = vector.broadcast %93 : vector<8x1xf32> to vector<8x32xf32>
    %95 = arith.subf %85, %94 : vector<8x32xf32>
    %96 = arith.mulf %95, %95 : vector<8x32xf32>
    %cst_47 = arith.constant dense<0.000000e+00> : vector<8xf32>
    %97 = vector.multi_reduction <add>, %96, %cst_47 [1] : vector<8x32xf32> to vector<8xf32>
    %98 = vector.shape_cast %97 : vector<8xf32> to vector<8x1xf32>
    %cst_48 = arith.constant 3.200000e+01 : f32
    %99 = vector.broadcast %cst_48 : f32 to vector<8x1xf32>
    %100 = arith.divf %98, %99 : vector<8x1xf32>
    %cst_49 = arith.constant 9.99999996E-13 : f32
    %101 = vector.broadcast %cst_49 : f32 to vector<8x1xf32>
    %102 = arith.addf %100, %101 : vector<8x1xf32>
    %103 = math.rsqrt %102 : vector<8x1xf32>
    %104 = vector.broadcast %103 : vector<8x1xf32> to vector<8x32xf32>
    %105 = arith.mulf %95, %104 : vector<8x32xf32>
    %106 = vector.broadcast %87 : vector<1x32xf32> to vector<8x32xf32>
    %107 = arith.mulf %105, %106 : vector<8x32xf32>
    %108 = vector.broadcast %89 : vector<1x32xf32> to vector<8x32xf32>
    %109 = arith.addf %107, %108 : vector<8x32xf32>
    %c0_50 = arith.constant 0 : index
    %c0_51 = arith.constant 0 : index
    %c0_52 = arith.constant 0 : index
    %110 = vector.load %arg11[%c0_50, %c0_51, %c0_52] : memref<2x32x64xf32, #tpu.memory_space<vmem>>, vector<1x32x64xf32>
    %111 = vector.shape_cast %110 : vector<1x32x64xf32> to vector<32x64xf32>
    %cst_53 = arith.constant dense<0.000000e+00> : vector<8x64xf32>
    %112 = tpu.matmul %109, %111, %cst_53 {dimension_numbers = #tpu.dot_dimension_numbers<[1], [0], [0], [1], [0, 0, 1, 1], [], []>} : vector<8x32xf32>, vector<32x64xf32>, vector<8x64xf32> -> vector<8x64xf32>
    %c0_54 = arith.constant 0 : index
    %c0_55 = arith.constant 0 : index
    %c0_56 = arith.constant 0 : index
    %113 = vector.load %arg12[%c0_54, %c0_55, %c0_56] : memref<2x1x64xf32, #tpu.memory_space<vmem>>, vector<1x1x64xf32>
    %114 = vector.shape_cast %113 : vector<1x1x64xf32> to vector<1x64xf32>
    %115 = vector.broadcast %114 : vector<1x64xf32> to vector<8x64xf32>
    %116 = arith.addf %112, %115 : vector<8x64xf32>
    %cst_57 = arith.constant 5.000000e-01 : f32
    %117 = vector.broadcast %cst_57 : f32 to vector<8x64xf32>
    %118 = arith.mulf %117, %116 : vector<8x64xf32>
    %cst_58 = arith.constant 4.471500e-02 : f32
    %119 = vector.broadcast %cst_58 : f32 to vector<8x64xf32>
    %120 = arith.mulf %119, %116 : vector<8x64xf32>
    %121 = arith.mulf %120, %116 : vector<8x64xf32>
    %122 = arith.mulf %121, %116 : vector<8x64xf32>
    %123 = arith.addf %116, %122 : vector<8x64xf32>
    %cst_59 = arith.constant 0.797884583 : f32
    %124 = vector.broadcast %cst_59 : f32 to vector<8x64xf32>
    %125 = arith.mulf %124, %123 : vector<8x64xf32>
    %126 = math.tanh %125 : vector<8x64xf32>
    %cst_60 = arith.constant 1.000000e+00 : f32
    %127 = vector.broadcast %cst_60 : f32 to vector<8x64xf32>
    %128 = arith.addf %127, %126 : vector<8x64xf32>
    %129 = arith.mulf %118, %128 : vector<8x64xf32>
    %c0_61 = arith.constant 0 : index
    %c0_62 = arith.constant 0 : index
    %c0_63 = arith.constant 0 : index
    %130 = vector.load %arg13[%c0_61, %c0_62, %c0_63] : memref<2x64x32xf32, #tpu.memory_space<vmem>>, vector<1x64x32xf32>
    %131 = vector.shape_cast %130 : vector<1x64x32xf32> to vector<64x32xf32>
    %cst_64 = arith.constant dense<0.000000e+00> : vector<8x32xf32>
    %132 = tpu.matmul %129, %131, %cst_64 {dimension_numbers = #tpu.dot_dimension_numbers<[1], [0], [0], [1], [0, 0, 1, 1], [], []>} : vector<8x64xf32>, vector<64x32xf32>, vector<8x32xf32> -> vector<8x32xf32>
    %c0_65 = arith.constant 0 : index
    %c0_66 = arith.constant 0 : index
    %c0_67 = arith.constant 0 : index
    %133 = vector.load %arg14[%c0_65, %c0_66, %c0_67] : memref<2x1x32xf32, #tpu.memory_space<vmem>>, vector<1x1x32xf32>
    %134 = vector.shape_cast %133 : vector<1x1x32xf32> to vector<1x32xf32>
    %135 = vector.broadcast %134 : vector<1x32xf32> to vector<8x32xf32>
    %136 = arith.addf %132, %135 : vector<8x32xf32>
    %137 = arith.addf %136, %109 : vector<8x32xf32>
    %c0_68 = arith.constant 0 : index
    %c0_69 = arith.constant 0 : index
    %c0_70 = arith.constant 0 : index
    %138 = vector.load %arg15[%c0_68, %c0_69, %c0_70] : memref<2x1x32xf32, #tpu.memory_space<vmem>>, vector<1x1x32xf32>
    %139 = vector.shape_cast %138 : vector<1x1x32xf32> to vector<1x32xf32>
    %c0_71 = arith.constant 0 : index
    %c0_72 = arith.constant 0 : index
    %c0_73 = arith.constant 0 : index
    %140 = vector.load %arg16[%c0_71, %c0_72, %c0_73] : memref<2x1x32xf32, #tpu.memory_space<vmem>>, vector<1x1x32xf32>
    %141 = vector.shape_cast %140 : vector<1x1x32xf32> to vector<1x32xf32>
    %cst_74 = arith.constant dense<0.000000e+00> : vector<8xf32>
    %142 = vector.multi_reduction <add>, %137, %cst_74 [1] : vector<8x32xf32> to vector<8xf32>
    %143 = vector.shape_cast %142 : vector<8xf32> to vector<8x1xf32>
    %cst_75 = arith.constant 3.200000e+01 : f32
    %144 = vector.broadcast %cst_75 : f32 to vector<8x1xf32>
    %145 = arith.divf %143, %144 : vector<8x1xf32>
    %146 = vector.broadcast %145 : vector<8x1xf32> to vector<8x32xf32>
    %147 = arith.subf %137, %146 : vector<8x32xf32>
    %148 = arith.mulf %147, %147 : vector<8x32xf32>
    %cst_76 = arith.constant dense<0.000000e+00> : vector<8xf32>
    %149 = vector.multi_reduction <add>, %148, %cst_76 [1] : vector<8x32xf32> to vector<8xf32>
    %150 = vector.shape_cast %149 : vector<8xf32> to vector<8x1xf32>
    %cst_77 = arith.constant 3.200000e+01 : f32
    %151 = vector.broadcast %cst_77 : f32 to vector<8x1xf32>
    %152 = arith.divf %150, %151 : vector<8x1xf32>
    %cst_78 = arith.constant 9.99999996E-13 : f32
    %153 = vector.broadcast %cst_78 : f32 to vector<8x1xf32>
    %154 = arith.addf %152, %153 : vector<8x1xf32>
    %155 = math.rsqrt %154 : vector<8x1xf32>
    %156 = vector.broadcast %155 : vector<8x1xf32> to vector<8x32xf32>
    %157 = arith.mulf %147, %156 : vector<8x32xf32>
    %158 = vector.broadcast %139 : vector<1x32xf32> to vector<8x32xf32>
    %159 = arith.mulf %157, %158 : vector<8x32xf32>
    %160 = vector.broadcast %141 : vector<1x32xf32> to vector<8x32xf32>
    %161 = arith.addf %159, %160 : vector<8x32xf32>
    %c1 = arith.constant 1 : index
    %c0_79 = arith.constant 0 : index
    %c0_80 = arith.constant 0 : index
    %162 = vector.load %arg5[%c1, %c0_79, %c0_80] : memref<2x32x96xf32, #tpu.memory_space<vmem>>, vector<1x32x96xf32>
    %163 = vector.shape_cast %162 : vector<1x32x96xf32> to vector<32x96xf32>
    %cst_81 = arith.constant dense<0.000000e+00> : vector<8x96xf32>
    %164 = tpu.matmul %161, %163, %cst_81 {dimension_numbers = #tpu.dot_dimension_numbers<[1], [0], [0], [1], [0, 0, 1, 1], [], []>} : vector<8x32xf32>, vector<32x96xf32>, vector<8x96xf32> -> vector<8x96xf32>
    %c1_82 = arith.constant 1 : index
    %c0_83 = arith.constant 0 : index
    %c0_84 = arith.constant 0 : index
    %165 = vector.load %arg6[%c1_82, %c0_83, %c0_84] : memref<2x1x96xf32, #tpu.memory_space<vmem>>, vector<1x1x96xf32>
    %166 = vector.shape_cast %165 : vector<1x1x96xf32> to vector<1x96xf32>
    %167 = vector.broadcast %166 : vector<1x96xf32> to vector<8x96xf32>
    %168 = arith.addf %164, %167 : vector<8x96xf32>
    %169 = vector.extract_strided_slice %168 {offsets = [0, 0], sizes = [8, 16], strides = [1, 1]} : vector<8x96xf32> to vector<8x16xf32>
    %170 = vector.extract_strided_slice %168 {offsets = [0, 32], sizes = [8, 16], strides = [1, 1]} : vector<8x96xf32> to vector<8x16xf32>
    %171 = vector.extract_strided_slice %168 {offsets = [0, 64], sizes = [8, 16], strides = [1, 1]} : vector<8x96xf32> to vector<8x16xf32>
    %172 = tpu.transpose %170, [1, 0] : vector<8x16xf32> -> vector<16x8xf32>
    %cst_85 = arith.constant dense<0.000000e+00> : vector<8x8xf32>
    %173 = tpu.matmul %169, %172, %cst_85 {dimension_numbers = #tpu.dot_dimension_numbers<[1], [0], [0], [1], [0, 0, 1, 1], [], []>} : vector<8x16xf32>, vector<16x8xf32>, vector<8x8xf32> -> vector<8x8xf32>
    %cst_86 = arith.constant 2.500000e-01 : f32
    %174 = vector.broadcast %cst_86 : f32 to vector<8x8xf32>
    %175 = arith.mulf %173, %174 : vector<8x8xf32>
    %176 = vector.broadcast %29 : vector<1x8xf32> to vector<8x8xf32>
    %177 = arith.addf %175, %176 : vector<8x8xf32>
    %cst_87 = arith.constant dense<0xFF800000> : vector<8xf32>
    %178 = vector.multi_reduction <maximumf>, %177, %cst_87 [1] : vector<8x8xf32> to vector<8xf32>
    %179 = vector.shape_cast %178 : vector<8xf32> to vector<8x1xf32>
    %180 = vector.broadcast %179 : vector<8x1xf32> to vector<8x8xf32>
    %181 = arith.subf %177, %180 : vector<8x8xf32>
    %182 = math.exp %181 : vector<8x8xf32>
    %cst_88 = arith.constant dense<0.000000e+00> : vector<8xf32>
    %183 = vector.multi_reduction <add>, %182, %cst_88 [1] : vector<8x8xf32> to vector<8xf32>
    %184 = vector.shape_cast %183 : vector<8xf32> to vector<8x1xf32>
    %185 = tpu.reciprocal %184 {approx = true} : vector<8x1xf32> -> vector<8x1xf32>
    %186 = vector.broadcast %185 : vector<8x1xf32> to vector<8x8xf32>
    %187 = arith.mulf %182, %186 : vector<8x8xf32>
    %cst_89 = arith.constant dense<0.000000e+00> : vector<8x16xf32>
    %188 = tpu.matmul %187, %171, %cst_89 {dimension_numbers = #tpu.dot_dimension_numbers<[1], [0], [0], [1], [0, 0, 1, 1], [], []>} : vector<8x8xf32>, vector<8x16xf32>, vector<8x16xf32> -> vector<8x16xf32>
    %189 = vector.extract_strided_slice %168 {offsets = [0, 16], sizes = [8, 16], strides = [1, 1]} : vector<8x96xf32> to vector<8x16xf32>
    %190 = vector.extract_strided_slice %168 {offsets = [0, 48], sizes = [8, 16], strides = [1, 1]} : vector<8x96xf32> to vector<8x16xf32>
    %191 = vector.extract_strided_slice %168 {offsets = [0, 80], sizes = [8, 16], strides = [1, 1]} : vector<8x96xf32> to vector<8x16xf32>
    %192 = tpu.transpose %190, [1, 0] : vector<8x16xf32> -> vector<16x8xf32>
    %cst_90 = arith.constant dense<0.000000e+00> : vector<8x8xf32>
    %193 = tpu.matmul %189, %192, %cst_90 {dimension_numbers = #tpu.dot_dimension_numbers<[1], [0], [0], [1], [0, 0, 1, 1], [], []>} : vector<8x16xf32>, vector<16x8xf32>, vector<8x8xf32> -> vector<8x8xf32>
    %cst_91 = arith.constant 2.500000e-01 : f32
    %194 = vector.broadcast %cst_91 : f32 to vector<8x8xf32>
    %195 = arith.mulf %193, %194 : vector<8x8xf32>
    %196 = vector.broadcast %29 : vector<1x8xf32> to vector<8x8xf32>
    %197 = arith.addf %195, %196 : vector<8x8xf32>
    %cst_92 = arith.constant dense<0xFF800000> : vector<8xf32>
    %198 = vector.multi_reduction <maximumf>, %197, %cst_92 [1] : vector<8x8xf32> to vector<8xf32>
    %199 = vector.shape_cast %198 : vector<8xf32> to vector<8x1xf32>
    %200 = vector.broadcast %199 : vector<8x1xf32> to vector<8x8xf32>
    %201 = arith.subf %197, %200 : vector<8x8xf32>
    %202 = math.exp %201 : vector<8x8xf32>
    %cst_93 = arith.constant dense<0.000000e+00> : vector<8xf32>
    %203 = vector.multi_reduction <add>, %202, %cst_93 [1] : vector<8x8xf32> to vector<8xf32>
    %204 = vector.shape_cast %203 : vector<8xf32> to vector<8x1xf32>
    %205 = tpu.reciprocal %204 {approx = true} : vector<8x1xf32> -> vector<8x1xf32>
    %206 = vector.broadcast %205 : vector<8x1xf32> to vector<8x8xf32>
    %207 = arith.mulf %202, %206 : vector<8x8xf32>
    %cst_94 = arith.constant dense<0.000000e+00> : vector<8x16xf32>
    %208 = tpu.matmul %207, %191, %cst_94 {dimension_numbers = #tpu.dot_dimension_numbers<[1], [0], [0], [1], [0, 0, 1, 1], [], []>} : vector<8x8xf32>, vector<8x16xf32>, vector<8x16xf32> -> vector<8x16xf32>
    %209 = tpu.concatenate %188, %208 in 1 : vector<8x16xf32>, vector<8x16xf32> -> vector<8x32xf32>
    %c1_95 = arith.constant 1 : index
    %c0_96 = arith.constant 0 : index
    %c0_97 = arith.constant 0 : index
    %210 = vector.load %arg7[%c1_95, %c0_96, %c0_97] : memref<2x32x32xf32, #tpu.memory_space<vmem>>, vector<1x32x32xf32>
    %211 = vector.shape_cast %210 : vector<1x32x32xf32> to vector<32x32xf32>
    %cst_98 = arith.constant dense<0.000000e+00> : vector<8x32xf32>
    %212 = tpu.matmul %209, %211, %cst_98 {dimension_numbers = #tpu.dot_dimension_numbers<[1], [0], [0], [1], [0, 0, 1, 1], [], []>} : vector<8x32xf32>, vector<32x32xf32>, vector<8x32xf32> -> vector<8x32xf32>
    %c1_99 = arith.constant 1 : index
    %c0_100 = arith.constant 0 : index
    %c0_101 = arith.constant 0 : index
    %213 = vector.load %arg8[%c1_99, %c0_100, %c0_101] : memref<2x1x32xf32, #tpu.memory_space<vmem>>, vector<1x1x32xf32>
    %214 = vector.shape_cast %213 : vector<1x1x32xf32> to vector<1x32xf32>
    %215 = vector.broadcast %214 : vector<1x32xf32> to vector<8x32xf32>
    %216 = arith.addf %212, %215 : vector<8x32xf32>
    %217 = arith.addf %216, %161 : vector<8x32xf32>
    %c1_102 = arith.constant 1 : index
    %c0_103 = arith.constant 0 : index
    %c0_104 = arith.constant 0 : index
    %218 = vector.load %arg9[%c1_102, %c0_103, %c0_104] : memref<2x1x32xf32, #tpu.memory_space<vmem>>, vector<1x1x32xf32>
    %219 = vector.shape_cast %218 : vector<1x1x32xf32> to vector<1x32xf32>
    %c1_105 = arith.constant 1 : index
    %c0_106 = arith.constant 0 : index
    %c0_107 = arith.constant 0 : index
    %220 = vector.load %arg10[%c1_105, %c0_106, %c0_107] : memref<2x1x32xf32, #tpu.memory_space<vmem>>, vector<1x1x32xf32>
    %221 = vector.shape_cast %220 : vector<1x1x32xf32> to vector<1x32xf32>
    %cst_108 = arith.constant dense<0.000000e+00> : vector<8xf32>
    %222 = vector.multi_reduction <add>, %217, %cst_108 [1] : vector<8x32xf32> to vector<8xf32>
    %223 = vector.shape_cast %222 : vector<8xf32> to vector<8x1xf32>
    %cst_109 = arith.constant 3.200000e+01 : f32
    %224 = vector.broadcast %cst_109 : f32 to vector<8x1xf32>
    %225 = arith.divf %223, %224 : vector<8x1xf32>
    %226 = vector.broadcast %225 : vector<8x1xf32> to vector<8x32xf32>
    %227 = arith.subf %217, %226 : vector<8x32xf32>
    %228 = arith.mulf %227, %227 : vector<8x32xf32>
    %cst_110 = arith.constant dense<0.000000e+00> : vector<8xf32>
    %229 = vector.multi_reduction <add>, %228, %cst_110 [1] : vector<8x32xf32> to vector<8xf32>
    %230 = vector.shape_cast %229 : vector<8xf32> to vector<8x1xf32>
    %cst_111 = arith.constant 3.200000e+01 : f32
    %231 = vector.broadcast %cst_111 : f32 to vector<8x1xf32>
    %232 = arith.divf %230, %231 : vector<8x1xf32>
    %cst_112 = arith.constant 9.99999996E-13 : f32
    %233 = vector.broadcast %cst_112 : f32 to vector<8x1xf32>
    %234 = arith.addf %232, %233 : vector<8x1xf32>
    %235 = math.rsqrt %234 : vector<8x1xf32>
    %236 = vector.broadcast %235 : vector<8x1xf32> to vector<8x32xf32>
    %237 = arith.mulf %227, %236 : vector<8x32xf32>
    %238 = vector.broadcast %219 : vector<1x32xf32> to vector<8x32xf32>
    %239 = arith.mulf %237, %238 : vector<8x32xf32>
    %240 = vector.broadcast %221 : vector<1x32xf32> to vector<8x32xf32>
    %241 = arith.addf %239, %240 : vector<8x32xf32>
    %c1_113 = arith.constant 1 : index
    %c0_114 = arith.constant 0 : index
    %c0_115 = arith.constant 0 : index
    %242 = vector.load %arg11[%c1_113, %c0_114, %c0_115] : memref<2x32x64xf32, #tpu.memory_space<vmem>>, vector<1x32x64xf32>
    %243 = vector.shape_cast %242 : vector<1x32x64xf32> to vector<32x64xf32>
    %cst_116 = arith.constant dense<0.000000e+00> : vector<8x64xf32>
    %244 = tpu.matmul %241, %243, %cst_116 {dimension_numbers = #tpu.dot_dimension_numbers<[1], [0], [0], [1], [0, 0, 1, 1], [], []>} : vector<8x32xf32>, vector<32x64xf32>, vector<8x64xf32> -> vector<8x64xf32>
    %c1_117 = arith.constant 1 : index
    %c0_118 = arith.constant 0 : index
    %c0_119 = arith.constant 0 : index
    %245 = vector.load %arg12[%c1_117, %c0_118, %c0_119] : memref<2x1x64xf32, #tpu.memory_space<vmem>>, vector<1x1x64xf32>
    %246 = vector.shape_cast %245 : vector<1x1x64xf32> to vector<1x64xf32>
    %247 = vector.broadcast %246 : vector<1x64xf32> to vector<8x64xf32>
    %248 = arith.addf %244, %247 : vector<8x64xf32>
    %cst_120 = arith.constant 5.000000e-01 : f32
    %249 = vector.broadcast %cst_120 : f32 to vector<8x64xf32>
    %250 = arith.mulf %249, %248 : vector<8x64xf32>
    %cst_121 = arith.constant 4.471500e-02 : f32
    %251 = vector.broadcast %cst_121 : f32 to vector<8x64xf32>
    %252 = arith.mulf %251, %248 : vector<8x64xf32>
    %253 = arith.mulf %252, %248 : vector<8x64xf32>
    %254 = arith.mulf %253, %248 : vector<8x64xf32>
    %255 = arith.addf %248, %254 : vector<8x64xf32>
    %cst_122 = arith.constant 0.797884583 : f32
    %256 = vector.broadcast %cst_122 : f32 to vector<8x64xf32>
    %257 = arith.mulf %256, %255 : vector<8x64xf32>
    %258 = math.tanh %257 : vector<8x64xf32>
    %cst_123 = arith.constant 1.000000e+00 : f32
    %259 = vector.broadcast %cst_123 : f32 to vector<8x64xf32>
    %260 = arith.addf %259, %258 : vector<8x64xf32>
    %261 = arith.mulf %250, %260 : vector<8x64xf32>
    %c1_124 = arith.constant 1 : index
    %c0_125 = arith.constant 0 : index
    %c0_126 = arith.constant 0 : index
    %262 = vector.load %arg13[%c1_124, %c0_125, %c0_126] : memref<2x64x32xf32, #tpu.memory_space<vmem>>, vector<1x64x32xf32>
    %263 = vector.shape_cast %262 : vector<1x64x32xf32> to vector<64x32xf32>
    %cst_127 = arith.constant dense<0.000000e+00> : vector<8x32xf32>
    %264 = tpu.matmul %261, %263, %cst_127 {dimension_numbers = #tpu.dot_dimension_numbers<[1], [0], [0], [1], [0, 0, 1, 1], [], []>} : vector<8x64xf32>, vector<64x32xf32>, vector<8x32xf32> -> vector<8x32xf32>
    %c1_128 = arith.constant 1 : index
    %c0_129 = arith.constant 0 : index
    %c0_130 = arith.constant 0 : index
    %265 = vector.load %arg14[%c1_128, %c0_129, %c0_130] : memref<2x1x32xf32, #tpu.memory_space<vmem>>, vector<1x1x32xf32>
    %266 = vector.shape_cast %265 : vector<1x1x32xf32> to vector<1x32xf32>
    %267 = vector.broadcast %266 : vector<1x32xf32> to vector<8x32xf32>
    %268 = arith.addf %264, %267 : vector<8x32xf32>
    %269 = arith.addf %268, %241 : vector<8x32xf32>
    %c1_131 = arith.constant 1 : index
    %c0_132 = arith.constant 0 : index
    %c0_133 = arith.constant 0 : index
    %270 = vector.load %arg15[%c1_131, %c0_132, %c0_133] : memref<2x1x32xf32, #tpu.memory_space<vmem>>, vector<1x1x32xf32>
    %271 = vector.shape_cast %270 : vector<1x1x32xf32> to vector<1x32xf32>
    %c1_134 = arith.constant 1 : index
    %c0_135 = arith.constant 0 : index
    %c0_136 = arith.constant 0 : index
    %272 = vector.load %arg16[%c1_134, %c0_135, %c0_136] : memref<2x1x32xf32, #tpu.memory_space<vmem>>, vector<1x1x32xf32>
    %273 = vector.shape_cast %272 : vector<1x1x32xf32> to vector<1x32xf32>
    %cst_137 = arith.constant dense<0.000000e+00> : vector<8xf32>
    %274 = vector.multi_reduction <add>, %269, %cst_137 [1] : vector<8x32xf32> to vector<8xf32>
    %275 = vector.shape_cast %274 : vector<8xf32> to vector<8x1xf32>
    %cst_138 = arith.constant 3.200000e+01 : f32
    %276 = vector.broadcast %cst_138 : f32 to vector<8x1xf32>
    %277 = arith.divf %275, %276 : vector<8x1xf32>
    %278 = vector.broadcast %277 : vector<8x1xf32> to vector<8x32xf32>
    %279 = arith.subf %269, %278 : vector<8x32xf32>
    %280 = arith.mulf %279, %279 : vector<8x32xf32>
    %cst_139 = arith.constant dense<0.000000e+00> : vector<8xf32>
    %281 = vector.multi_reduction <add>, %280, %cst_139 [1] : vector<8x32xf32> to vector<8xf32>
    %282 = vector.shape_cast %281 : vector<8xf32> to vector<8x1xf32>
    %cst_140 = arith.constant 3.200000e+01 : f32
    %283 = vector.broadcast %cst_140 : f32 to vector<8x1xf32>
    %284 = arith.divf %282, %283 : vector<8x1xf32>
    %cst_141 = arith.constant 9.99999996E-13 : f32
    %285 = vector.broadcast %cst_141 : f32 to vector<8x1xf32>
    %286 = arith.addf %284, %285 : vector<8x1xf32>
    %287 = math.rsqrt %286 : vector<8x1xf32>
    %288 = vector.broadcast %287 : vector<8x1xf32> to vector<8x32xf32>
    %289 = arith.mulf %279, %288 : vector<8x32xf32>
    %290 = vector.broadcast %271 : vector<1x32xf32> to vector<8x32xf32>
    %291 = arith.mulf %289, %290 : vector<8x32xf32>
    %292 = vector.broadcast %273 : vector<1x32xf32> to vector<8x32xf32>
    %293 = arith.addf %291, %292 : vector<8x32xf32>
    %c0_142 = arith.constant 0 : index
    %c0_143 = arith.constant 0 : index
    %294 = vector.load %arg17[%c0_142, %c0_143] : memref<32x32xf32, #tpu.memory_space<vmem>>, vector<32x32xf32>
    %cst_144 = arith.constant dense<0.000000e+00> : vector<8x32xf32>
    %295 = tpu.matmul %293, %294, %cst_144 {dimension_numbers = #tpu.dot_dimension_numbers<[1], [0], [0], [1], [0, 0, 1, 1], [], []>} : vector<8x32xf32>, vector<32x32xf32>, vector<8x32xf32> -> vector<8x32xf32>
    %c0_145 = arith.constant 0 : index
    %c0_146 = arith.constant 0 : index
    %296 = vector.load %arg18[%c0_145, %c0_146] : memref<1x32xf32, #tpu.memory_space<vmem>>, vector<1x32xf32>
    %297 = vector.broadcast %296 : vector<1x32xf32> to vector<8x32xf32>
    %298 = arith.addf %295, %297 : vector<8x32xf32>
    %299 = math.tanh %298 : vector<8x32xf32>
    %c0_147 = arith.constant 0 : index
    %c0_148 = arith.constant 0 : index
    %300 = vector.load %arg19[%c0_147, %c0_148] : memref<32x3xf32, #tpu.memory_space<vmem>>, vector<32x3xf32>
    %cst_149 = arith.constant dense<0.000000e+00> : vector<8x3xf32>
    %301 = tpu.matmul %299, %300, %cst_149 {dimension_numbers = #tpu.dot_dimension_numbers<[1], [0], [0], [1], [0, 0, 1, 1], [], []>} : vector<8x32xf32>, vector<32x3xf32>, vector<8x3xf32> -> vector<8x3xf32>
    %c0_150 = arith.constant 0 : index
    %c0_151 = arith.constant 0 : index
    %302 = vector.load %arg20[%c0_150, %c0_151] : memref<1x3xf32, #tpu.memory_space<vmem>>, vector<1x3xf32>
    %303 = vector.broadcast %302 : vector<1x3xf32> to vector<8x3xf32>
    %304 = arith.addf %301, %303 : vector<8x3xf32>
    %305 = vector.extract_strided_slice %304 {offsets = [0, 0], sizes = [1, 3], strides = [1, 1]} : vector<8x3xf32> to vector<1x3xf32>
    %c0_152 = arith.constant 0 : index
    %c0_153 = arith.constant 0 : index
    %c0_154 = arith.constant 0 : index
    %306 = vector.load %arg21[%c0_152, %c0_153, %c0_154] : memref<1x1x3xf32, #tpu.memory_space<vmem>>, vector<1x1x3xf32>
    %307 = vector.shape_cast %306 : vector<1x1x3xf32> to vector<1x3xf32>
    %308 = vector.shape_cast %305 : vector<1x3xf32> to vector<1x1x3xf32>
    tpu.vector_store %arg21[%c0_152, %c0_153, %c0_154], %308 {strides = array<i32>} : memref<1x1x3xf32, #tpu.memory_space<vmem>>, vector<1x1x3xf32>,
    return
  }
  func.func @transform_0(%arg0: i32) -> (i32, i32, i32) {
    %c0_i32 = arith.constant 0 : i32
    %c0_i32_0 = arith.constant 0 : i32
    %c0_i32_1 = arith.constant 0 : i32
    return %arg0, %c0_i32, %c0_i32_0 : i32, i32, i32
  }
  func.func @transform_1(%arg0: i32) -> (i32, i32, i32) {
    %c0_i32 = arith.constant 0 : i32
    %c0_i32_0 = arith.constant 0 : i32
    %c0_i32_1 = arith.constant 0 : i32
    return %arg0, %c0_i32, %c0_i32_0 : i32, i32, i32
  }
  func.func @transform_2(%arg0: i32) -> (i32, i32) {
    %c0_i32 = arith.constant 0 : i32
    %c0_i32_0 = arith.constant 0 : i32
    %c0_i32_1 = arith.constant 0 : i32
    return %c0_i32, %c0_i32_0 : i32, i32
  }
  func.func @transform_3(%arg0: i32) -> (i32, i32) {
    %c0_i32 = arith.constant 0 : i32
    %c0_i32_0 = arith.constant 0 : i32
    %c0_i32_1 = arith.constant 0 : i32
    return %c0_i32, %c0_i32_0 : i32, i32
  }
  func.func @transform_4(%arg0: i32) -> (i32, i32, i32) {
    %c0_i32 = arith.constant 0 : i32
    %c0_i32_0 = arith.constant 0 : i32
    %c0_i32_1 = arith.constant 0 : i32
    %c0_i32_2 = arith.constant 0 : i32
    return %c0_i32, %c0_i32_0, %c0_i32_1 : i32, i32, i32
  }
  func.func @transform_5(%arg0: i32) -> (i32, i32, i32) {
    %c0_i32 = arith.constant 0 : i32
    %c0_i32_0 = arith.constant 0 : i32
    %c0_i32_1 = arith.constant 0 : i32
    %c0_i32_2 = arith.constant 0 : i32
    return %c0_i32, %c0_i32_0, %c0_i32_1 : i32, i32, i32
  }
  func.func @transform_6(%arg0: i32) -> (i32, i32, i32) {
    %c0_i32 = arith.constant 0 : i32
    %c0_i32_0 = arith.constant 0 : i32
    %c0_i32_1 = arith.constant 0 : i32
    %c0_i32_2 = arith.constant 0 : i32
    return %c0_i32, %c0_i32_0, %c0_i32_1 : i32, i32, i32
  }
  func.func @transform_7(%arg0: i32) -> (i32, i32, i32) {
    %c0_i32 = arith.constant 0 : i32
    %c0_i32_0 = arith.constant 0 : i32
    %c0_i32_1 = arith.constant 0 : i32
    %c0_i32_2 = arith.constant 0 : i32
    return %c0_i32, %c0_i32_0, %c0_i32_1 : i32, i32, i32
  }
  func.func @transform_8(%arg0: i32) -> (i32, i32, i32) {
    %c0_i32 = arith.constant 0 : i32
    %c0_i32_0 = arith.constant 0 : i32
    %c0_i32_1 = arith.constant 0 : i32
    %c0_i32_2 = arith.constant 0 : i32
    return %c0_i32, %c0_i32_0, %c0_i32_1 : i32, i32, i32
  }
  func.func @transform_9(%arg0: i32) -> (i32, i32, i32) {
    %c0_i32 = arith.constant 0 : i32
    %c0_i32_0 = arith.constant 0 : i32
    %c0_i32_1 = arith.constant 0 : i32
    %c0_i32_2 = arith.constant 0 : i32
    return %c0_i32, %c0_i32_0, %c0_i32_1 : i32, i32, i32
  }
  func.func @transform_10(%arg0: i32) -> (i32, i32, i32) {
    %c0_i32 = arith.constant 0 : i32
    %c0_i32_0 = arith.constant 0 : i32
    %c0_i32_1 = arith.constant 0 : i32
    %c0_i32_2 = arith.constant 0 : i32
    return %c0_i32, %c0_i32_0, %c0_i32_1 : i32, i32, i32
  }
  func.func @transform_11(%arg0: i32) -> (i32, i32, i32) {
    %c0_i32 = arith.constant 0 : i32
    %c0_i32_0 = arith.constant 0 : i32
    %c0_i32_1 = arith.constant 0 : i32
    %c0_i32_2 = arith.constant 0 : i32
    return %c0_i32, %c0_i32_0, %c0_i32_1 : i32, i32, i32
  }
  func.func @transform_12(%arg0: i32) -> (i32, i32, i32) {
    %c0_i32 = arith.constant 0 : i32
    %c0_i32_0 = arith.constant 0 : i32
    %c0_i32_1 = arith.constant 0 : i32
    %c0_i32_2 = arith.constant 0 : i32
    return %c0_i32, %c0_i32_0, %c0_i32_1 : i32, i32, i32
  }
  func.func @transform_13(%arg0: i32) -> (i32, i32, i32) {
    %c0_i32 = arith.constant 0 : i32
    %c0_i32_0 = arith.constant 0 : i32
    %c0_i32_1 = arith.constant 0 : i32
    %c0_i32_2 = arith.constant 0 : i32
    return %c0_i32, %c0_i32_0, %c0_i32_1 : i32, i32, i32
  }
  func.func @transform_14(%arg0: i32) -> (i32, i32, i32) {
    %c0_i32 = arith.constant 0 : i32
    %c0_i32_0 = arith.constant 0 : i32
    %c0_i32_1 = arith.constant 0 : i32
    %c0_i32_2 = arith.constant 0 : i32
    return %c0_i32, %c0_i32_0, %c0_i32_1 : i32, i32, i32
  }
  func.func @transform_15(%arg0: i32) -> (i32, i32, i32) {
    %c0_i32 = arith.constant 0 : i32
    %c0_i32_0 = arith.constant 0 : i32
    %c0_i32_1 = arith.constant 0 : i32
    %c0_i32_2 = arith.constant 0 : i32
    return %c0_i32, %c0_i32_0, %c0_i32_1 : i32, i32, i32
  }
  func.func @transform_16(%arg0: i32) -> (i32, i32) {
    %c0_i32 = arith.constant 0 : i32
    %c0_i32_0 = arith.constant 0 : i32
    %c0_i32_1 = arith.constant 0 : i32
    return %c0_i32, %c0_i32_0 : i32, i32
  }
  func.func @transform_17(%arg0: i32) -> (i32, i32) {
    %c0_i32 = arith.constant 0 : i32
    %c0_i32_0 = arith.constant 0 : i32
    %c0_i32_1 = arith.constant 0 : i32
    return %c0_i32, %c0_i32_0 : i32, i32
  }
  func.func @transform_18(%arg0: i32) -> (i32, i32) {
    %c0_i32 = arith.constant 0 : i32
    %c0_i32_0 = arith.constant 0 : i32
    %c0_i32_1 = arith.constant 0 : i32
    return %c0_i32, %c0_i32_0 : i32, i32
  }
  func.func @transform_19(%arg0: i32) -> (i32, i32) {
    %c0_i32 = arith.constant 0 : i32
    %c0_i32_0 = arith.constant 0 : i32
    %c0_i32_1 = arith.constant 0 : i32
    return %c0_i32, %c0_i32_0 : i32, i32
  }
  func.func @transform_20(%arg0: i32) -> (i32, i32, i32) {
    %c0_i32 = arith.constant 0 : i32
    %c0_i32_0 = arith.constant 0 : i32
    %c0_i32_1 = arith.constant 0 : i32
    return %arg0, %c0_i32, %c0_i32_0 : i32, i32, i32
  }
}

</mosaic_0001>

<bundles_post_ra>
// kernel: tpu_custom_call.1
= control target key start
LH: loop header
LB: loop body
LE: loop exit
PB: predicated region body
PF: predicated region fallthrough
CT: control target
= control target key end

     0   :  { %s4728_s0 = inlined_call_operand.hbm [shape: f32[2,8,32], index: 0, kind: input, shape index: {}]   ;;  %s4729_s1 = inlined_call_operand.hbm [shape: f32[2,1,8], index: 1, kind: input, shape index: {}]   ;;  %s4730_s2 = inlined_call_operand.hbm [shape: f32[1,32], index: 2, kind: input, shape index: {}]   ;;  %s4731_s3 = inlined_call_operand.hbm [shape: f32[1,32], index: 3, kind: input, shape index: {}]   ;;  %s4732_s4 = inlined_call_operand.vmem [shape: f32[2,32,96], index: 4, kind: input, shape index: {}]   ;;  %s4733_s5 = inlined_call_operand.hbm [shape: f32[2,1,96], index: 5, kind: input, shape index: {}]   ;;  %s4734_s6 = inlined_call_operand.vmem [shape: f32[2,32,32], index: 6, kind: input, shape index: {}]   ;;  %s4735_s7 = inlined_call_operand.hbm [shape: f32[2,1,32], index: 7, kind: input, shape index: {}]   ;;  %s4736_s8 = inlined_call_operand.hbm [shape: f32[2,1,32], index: 8, kind: input, shape index: {}]   ;;  %s4737_s9 = inlined_call_operand.hbm [shape: f32[2,1,32], index: 9, kind: input, shape index: {}]   ;;  %s4738_s10 = inlined_call_operand.vmem [shape: f32[2,32,64], index: 10, kind: input, shape index: {}]   ;;  %s4739_s11 = inlined_call_operand.hbm [shape: f32[2,1,64], index: 11, kind: input, shape index: {}]   ;;  %s4740_s12 = inlined_call_operand.vmem [shape: f32[2,64,32], index: 12, kind: input, shape index: {}]   ;;  %s4741_s13 = inlined_call_operand.hbm [shape: f32[2,1,32], index: 13, kind: input, shape index: {}]   ;;  %s4742_s14 = inlined_call_operand.hbm [shape: f32[2,1,32], index: 14, kind: input, shape index: {}]   ;;  %s4743_s15 = inlined_call_operand.hbm [shape: f32[2,1,32], index: 15, kind: input, shape index: {}]   ;;  %s4744_s16 = inlined_call_operand.vmem [shape: f32[32,32], index: 16, kind: input, shape index: {}]   ;;  %s4745_s17 = inlined_call_operand.hbm [shape: f32[1,32], index: 17, kind: input, shape index: {}]   ;;  %s4746_s18 = inlined_call_operand.vmem [shape: f32[32,3], index: 18, kind: input, shape index: {}]   ;;  %s4747_s19 = inlined_call_operand.vmem [shape: f32[1,3], index: 19, kind: input, shape index: {}]   ;;  %s4748_s20 = inlined_call_operand.hbm [shape: f32[2,1,3], index: 20, kind: output, shape index: {}]  }
   0x1   :  { %4778 = sst [smem:[#allocation35_spill]] %s4728_s0 }
   0x2   :  { %4779 = sst [smem:[#allocation36_spill]] %s4729_s1 }
   0x3   :  { %4780 = sst [smem:[#allocation37_spill]] %s4730_s2 }
   0x4   :  { %4781 = sst [smem:[#allocation38_spill]] %s4731_s3 }
   0x5   :  { %4782 = sst [smem:[#allocation39_spill]] %s4732_s4 }
   0x6   :  { %4783 = sst [smem:[#allocation40_spill]] %s4733_s5 }
   0x7   :  { %4784 = sst [smem:[#allocation41_spill]] %s4734_s6 }
   0x8   :  { %4785 = sst [smem:[#allocation42_spill]] %s4735_s7 }
   0x9   :  { %4786 = sst [smem:[#allocation43_spill]] %s4736_s8 }
   0xa   :  { %4787 = sst [smem:[#allocation44_spill]] %s4737_s9 }
   0xb   :  { %4788 = sst [smem:[#allocation45_spill]] %s4738_s10 }
   0xc   :  { %4789 = sst [smem:[#allocation46_spill]] %s4739_s11 }
   0xd   :  { %4790 = sst [smem:[#allocation47_spill]] %s4740_s12 }
   0xe   :  { %4791 = sst [smem:[#allocation48_spill]] %s4744_s16 }
   0xf   :  { %4792 = sst [smem:[#allocation49_spill]] %s4746_s18 }
  0x10   :  { %4793 = sst [smem:[#allocation50_spill]] %s4747_s19 }
  0x11   :  { %4794 = sst [smem:[#allocation51_spill]] %s4748_s20 }
  0x12   :  { %25 = vsyncpa [#allocation3], 0 }
  0x13   :  { %27 = vsyncpa [#allocation3 + $0x1], 0 }
  0x14   :  { %28 = vsyncpa [#allocation6], 0 }
  0x15   :  { %30 = vsyncpa [#allocation6 + $0x1], 0 }
  0x16   :  { %31 = vsyncpa [#allocation9], 0 }
  0x17   :  { %32 = vsyncpa [#allocation12], 0 }
  0x18   :  { %33 = vsyncpa [#allocation15], 0 }
  0x19   :  { %34 = vsyncpa [#allocation18], 0 }
  0x1a   :  { %35 = vsyncpa [#allocation21], 0 }
  0x1b   :  { %36 = vsyncpa [#allocation4], 0 }
  0x1c   :  { %38 = vsyncpa [#allocation4 + $0x1], 0  ;;  %s3961_s1 = smov 0   ;;  %s3963_s22 = smov 0  }
  0x1d   :  { %s3965_s23 = smov 0   ;;  %s3967_s24 = smov 0  }
  0x1e LB: > { %s3831_s2 = smov [#allocation7]   ;;  %s3982_s3 = sadd.s32 4294967295, %s3829_s24   ;;  %s3829_s24 = sphi %s3967_s24, %s4852_s24   ;;  %s3825_s23 = sphi %s3965_s23, %s4851_s23   ;;  %s3821_s22 = sphi %s3963_s22, %s4850_s22   ;;  %s3817_s1 = sphi %s3961_s1, %s4849_s1  }
  0x1f   : > { %s518_s25 = sshll.u32 %s3831_s2, 4  ;;  %4795 = sst [smem:[#allocation33_spill]] %s3982_s3  ;;  %s3987_s25 = int_to_ptr.vmem [resolvable:$true] %s518_s25 }
  0x20   : > { %p2756_p0 = scmp.ge.s32.totalorder %s3829_s24, 1  ;;  %p4766_p1 = scmp.eq.s32.totalorder %s3982_s3, 0 }
  0x21   : > { %p505_p2 = scmp.lt.s32.totalorder %s3829_s24, 3  ;;  %s3832_s27 = smov [#allocation8]  }
  0x22   : > { %s529_s28 = sshll.u32 %s3832_s27, 4  ;;  %s3833_s29 = smov [#allocation11]   ;;  %s3996_s28 = int_to_ptr.vmem [resolvable:$true] %s529_s28 }
  0x23   : > { %p3989_p3 = pnand %p2756_p0, %p505_p2  ;;  %s558_s30 = sshll.u32 %s3833_s29, 4  ;;  %s4004_s30 = int_to_ptr.vmem [resolvable:$true] %s558_s30 }
  0x24   : > { %s4799_s2 = sld [smem:[#allocation37_spill]] }
  0x25   : > { %s4796_s26 = scalar_select %p3989_p3, 1, 0 }
  0x26   : > { %p3212_p5 = pneg %p3989_p3 }
  0x27   : > { %4797 = sst [smem:[#allocation34_spill]] %s4796_s26 }
  0x28   : > { %p4000_p6 = pnand %p3212_p5, %p4766_p1 }
  0x2a   : > { %s3367_s20 = scalar_lea.hbm %s4799_s2, 16  ;;  %p4014_p8 = pneg %p4000_p6 }
  0x2b   : > { %p3368_p7 = scmp.ne.s32.totalorder %s4799_s2, %s3367_s20  ;;  %p3374_p11 = scmp.lt.u32.totalorder %s3367_s20, %s4799_s2 }
  0x2d   : > { %p3370_p9 = pnand %p4014_p8, %p3368_p7 }
  0x2f   : > { %p3371_p10 = pneg %p3370_p9 }
  0x31   : > { %p3376_p12 = pnand %p3374_p11, %p3371_p10 }
  0x33   : > { %3379 = shalt.err (!%p3376_p12)
}
  0x34   : > { %s3380_s18 = scalar_lea.vmem %s3987_s25, 16  ;;  %s3387_s19 = scalar_lea.vmem %s3987_s25, 32 }
  0x35   : > { %p3381_p13 = scmp.ne.s32.totalorder %s3987_s25, %s3380_s18  ;;  %p3388_p5 = scmp.lt.s32.totalorder %s3987_s25, %s3987_s25 }
  0x36   : > { %p3389_p7 = scmp.lt.s32.totalorder %s3387_s19, %s3380_s18 }
  0x37   : > { %p3383_p0 = pnand %p3381_p13, %p4014_p8 }
  0x38   : > { %p3390_p9 = por %p3389_p7, %p3388_p5 }
  0x39   : > { %p3384_p2 = pneg %p3383_p0 }
  0x3b   : > { %p3391_p4 = pnand %p3390_p9, %p3384_p2 }
  0x3d   : > { %3394 = shalt.err (!%p3391_p4)
}
  0x3e   : > { %3215 = dma.hbm_to_vmem [thread:$0]  (!%p4000_p6), %s4799_s2, 16, %s3987_s25, [#allocation6]  }
  0x3f   : > { %s4801_s29 = sld [smem:[#allocation38_spill]] }
  0x45   : > { %s3395_s12 = scalar_lea.hbm %s4801_s29, 16 }
  0x46   : > { %p3396_p10 = scmp.ne.s32.totalorder %s4801_s29, %s3395_s12  ;;  %p3402_p4 = scmp.lt.u32.totalorder %s3395_s12, %s4801_s29 }
  0x48   : > { %p3398_p11 = pnand %p3396_p10, %p4014_p8 }
  0x4a   : > { %p3399_p12 = pneg %p3398_p11 }
  0x4c   : > { %p3404_p13 = pnand %p3402_p4, %p3399_p12 }
  0x4e   : > { %3407 = shalt.err (!%p3404_p13)
}
  0x4f   : > { %s3408_s25 = scalar_lea.vmem %s3996_s28, 16  ;;  %s3415_s6 = scalar_lea.vmem %s3996_s28, 32 }
  0x50   : > { %p3409_p0 = scmp.ne.s32.totalorder %s3996_s28, %s3408_s25  ;;  %p3416_p7 = scmp.lt.s32.totalorder %s3996_s28, %s3996_s28 }
  0x51   : > { %p3417_p9 = scmp.lt.s32.totalorder %s3415_s6, %s3408_s25 }
  0x52   : > { %p3411_p2 = pnand %p3409_p0, %p4014_p8 }
  0x53   : > { %p3418_p10 = por %p3417_p9, %p3416_p7 }
  0x54   : > { %p3412_p5 = pneg %p3411_p2 }
  0x56   : > { %p3419_p11 = pnand %p3418_p10, %p3412_p5 }
  0x58   : > { %3422 = shalt.err (!%p3419_p11)
}
  0x59   : > { %3218 = dma.hbm_to_vmem [thread:$0]  (!%p4000_p6), %s4801_s29, 16, %s3996_s28, [#allocation9]  }
  0x5a   : > { %s4802_s7 = sld [smem:[#allocation42_spill]] }
  0x60   : > { %s3423_s0 = scalar_lea.hbm %s4802_s7, 32 }
  0x61   : > { %p3424_p12 = scmp.ne.s32.totalorder %s4802_s7, %s3423_s0  ;;  %p3430_p0 = scmp.lt.u32.totalorder %s3423_s0, %s4802_s7 }
  0x63   : > { %p3426_p4 = pnand %p3424_p12, %p4014_p8 }
  0x65   : > { %p3427_p13 = pneg %p3426_p4 }
  0x67   : > { %p3432_p2 = pnand %p3430_p0, %p3427_p13 }
  0x69   : > { %3435 = shalt.err (!%p3432_p2)
}
  0x6a   : > { %s3436_s28 = scalar_lea.vmem %s4004_s30, 32  ;;  %p3444_p10 = scmp.lt.s32.totalorder %s4004_s30, %s4004_s30 }
  0x6b   : > { %p3437_p5 = scmp.ne.s32.totalorder %s4004_s30, %s3436_s28  ;;  %p3445_p11 = scmp.lt.s32.totalorder %s3436_s28, %s3436_s28 }
  0x6d   : > { %p3439_p7 = pnand %p3437_p5, %p4014_p8  ;;  %p3446_p12 = por %p3445_p11, %p3444_p10 }
  0x6f   : > { %p3440_p9 = pneg %p3439_p7 }
  0x71   : > { %p3447_p4 = pnand %p3446_p12, %p3440_p9 }
  0x73   : > { %3450 = shalt.err (!%p3447_p4)
}
  0x74   : > { %s3834_s6 = smov 16   ;;  %s3835_s10 = smov 1  }
  0x75   : > { %3224 = dma.hbm_to_vmem [thread:$0]  (!%p4000_p6), %s4802_s7, 32, %s4004_s30, [#allocation12], %s3834_s6, %s3834_s6, %s3835_s10  }
  0x76   : > { %s3836_s20 = smov [#allocation14]   ;;  %s3837_s21 = smov [#allocation17]  }
  0x77   : > { %s584_s0 = sshll.u32 %s3836_s20, 4  ;;  %s616_s18 = sshll.u32 %s3837_s21, 4  ;;  %s585_s0 = int_to_ptr.vmem [resolvable:$true] %s584_s0  ;;  %s617_s18 = int_to_ptr.vmem [resolvable:$true] %s616_s18 }
  0x78   : > { %s4803_s9 = sld [smem:[#allocation44_spill]] }
  0x7e   : > { %s3451_s28 = scalar_lea.hbm %s4803_s9, 32 }
  0x7f   : > { %p3452_p13 = scmp.ne.s32.totalorder %s4803_s9, %s3451_s28  ;;  %p3458_p5 = scmp.lt.u32.totalorder %s3451_s28, %s4803_s9 }
  0x81   : > { %p3454_p0 = pnand %p3452_p13, %p4014_p8 }
  0x83   : > { %p3455_p2 = pneg %p3454_p0 }
  0x85   : > { %p3460_p7 = pnand %p3458_p5, %p3455_p2 }
  0x87   : > { %3463 = shalt.err (!%p3460_p7)
}
  0x88   : > { %s3464_s30 = scalar_lea.vmem %s585_s0, 32  ;;  %p3472_p12 = scmp.lt.s32.totalorder %s585_s0, %s585_s0 }
  0x89   : > { %p3465_p9 = scmp.ne.s32.totalorder %s585_s0, %s3464_s30  ;;  %p3473_p4 = scmp.lt.s32.totalorder %s3464_s30, %s3464_s30 }
  0x8b   : > { %p3467_p10 = pnand %p3465_p9, %p4014_p8  ;;  %p3474_p1 = por %p3473_p4, %p3472_p12 }
  0x8d   : > { %p3468_p11 = pneg %p3467_p10 }
  0x8f   : > { %p3475_p3 = pnand %p3474_p1, %p3468_p11 }
  0x91   : > { %3478 = shalt.err (!%p3475_p3)
}
  0x92   : > { %3230 = dma.hbm_to_vmem [thread:$0]  (!%p4000_p6), %s4803_s9, 32, %s585_s0, [#allocation15], %s3834_s6, %s3834_s6, %s3835_s10  }
  0x93   : > { %s3479_s12 = scalar_lea.hbm %s4741_s13, 32 }
  0x94   : > { %p3480_p1 = scmp.ne.s32.totalorder %s4741_s13, %s3479_s12  ;;  %p3486_p0 = scmp.lt.u32.totalorder %s3479_s12, %s4741_s13 }
  0x96   : > { %p3482_p3 = pnand %p3480_p1, %p4014_p8 }
  0x98   : > { %p3483_p13 = pneg %p3482_p3 }
  0x9a   : > { %p3488_p2 = pnand %p3486_p0, %p3483_p13 }
  0x9c   : > { %3491 = shalt.err (!%p3488_p2)
}
  0x9d   : > { %s3492_s25 = scalar_lea.vmem %s617_s18, 32  ;;  %p3500_p10 = scmp.lt.s32.totalorder %s617_s18, %s617_s18 }
  0x9e   : > { %p3493_p5 = scmp.ne.s32.totalorder %s617_s18, %s3492_s25  ;;  %p3501_p11 = scmp.lt.s32.totalorder %s3492_s25, %s3492_s25 }
  0xa0   : > { %p3495_p7 = pnand %p3493_p5, %p4014_p8  ;;  %p3502_p12 = por %p3501_p11, %p3500_p10 }
  0xa2   : > { %p3496_p9 = pneg %p3495_p7 }
  0xa4   : > { %p3503_p4 = pnand %p3502_p12, %p3496_p9 }
  0xa6   : > { %3506 = shalt.err (!%p3503_p4)
}
  0xa7   : > { %3236 = dma.hbm_to_vmem [thread:$0]  (!%p4000_p6), %s4741_s13, 32, %s617_s18, [#allocation18], %s3834_s6, %s3834_s6, %s3835_s10  }
  0xa8   : > { %s3838_s30 = smov [#allocation20]   ;;  %s3839_s26 = smov [#allocation10]  }
  0xa9   : > { %s642_s3 = sshll.u32 %s3838_s30, 4  ;;  %s542_s2 = sshll.u32 %s3839_s26, 4  ;;  %s643_s3 = int_to_ptr.vmem [resolvable:$true] %s642_s3  ;;  %s543_s2 = int_to_ptr.vmem [resolvable:$true] %s542_s2 }
  0xaa   : > { %s3507_s16 = scalar_lea.hbm %s4743_s15, 32 }
  0xab   : > { %p3508_p1 = scmp.ne.s32.totalorder %s4743_s15, %s3507_s16  ;;  %p3514_p0 = scmp.lt.u32.totalorder %s3507_s16, %s4743_s15 }
  0xad   : > { %p3510_p3 = pnand %p3508_p1, %p4014_p8 }
  0xaf   : > { %p3511_p13 = pneg %p3510_p3 }
  0xb1   : > { %p3516_p2 = pnand %p3514_p0, %p3511_p13 }
  0xb3   : > { %3519 = shalt.err (!%p3516_p2)
}
  0xb4   : > { %s3520_s18 = scalar_lea.vmem %s643_s3, 32  ;;  %p3528_p10 = scmp.lt.s32.totalorder %s643_s3, %s643_s3 }
  0xb5   : > { %p3521_p5 = scmp.ne.s32.totalorder %s643_s3, %s3520_s18  ;;  %p3529_p11 = scmp.lt.s32.totalorder %s3520_s18, %s3520_s18 }
  0xb7   : > { %p3523_p7 = pnand %p3521_p5, %p4014_p8  ;;  %p3530_p12 = por %p3529_p11, %p3528_p10 }
  0xb9   : > { %p3524_p9 = pneg %p3523_p7 }
  0xbb   : > { %p3531_p4 = pnand %p3530_p12, %p3524_p9 }
  0xbd   : > { %3534 = shalt.err (!%p3531_p4)
}
  0xbe   : > { %3242 = dma.hbm_to_vmem [thread:$0]  (!%p4000_p6), %s4743_s15, 32, %s643_s3, [#allocation21], %s3834_s6, %s3834_s6, %s3835_s10  }
  0xbf   : > { %s4804_s5 = sld [smem:[#allocation40_spill]] }
  0xc5   : > { %s3535_s29 = scalar_lea.hbm %s4804_s5, 32 }
  0xc6   : > { %p3536_p1 = scmp.ne.s32.totalorder %s4804_s5, %s3535_s29  ;;  %p3542_p0 = scmp.lt.u32.totalorder %s3535_s29, %s4804_s5 }
  0xc8   : > { %p3538_p3 = pnand %p3536_p1, %p4014_p8 }
  0xca   : > { %p3539_p13 = pneg %p3538_p3 }
  0xcc   : > { %p3544_p2 = pnand %p3542_p0, %p3539_p13 }
  0xce   : > { %3547 = shalt.err (!%p3544_p2)
}
  0xcf   : > { %s3548_s19 = scalar_lea.vmem %s543_s2, 32  ;;  %p3556_p10 = scmp.lt.s32.totalorder %s543_s2, %s543_s2 }
  0xd0   : > { %p3549_p5 = scmp.ne.s32.totalorder %s543_s2, %s3548_s19  ;;  %p3557_p11 = scmp.lt.s32.totalorder %s3548_s19, %s3548_s19 }
  0xd2   : > { %p3551_p7 = pnand %p3549_p5, %p4014_p8  ;;  %p3558_p12 = por %p3557_p11, %p3556_p10 }
  0xd4   : > { %p3552_p9 = pneg %p3551_p7 }
  0xd6   : > { %p3559_p4 = pnand %p3558_p12, %p3552_p9 }
  0xd8   : > { %3562 = shalt.err (!%p3559_p4)
}
  0xd9   : > { %3221 = dma.hbm_to_vmem [thread:$0]  (!%p4000_p6), %s4804_s5, 32, %s543_s2, [#allocation9], %s3834_s6, %s3834_s6, %s3835_s10  }
  0xda   : > { %s3840_s18 = smov [#allocation13]   ;;  %s3841_s28 = smov [#allocation16]  }
  0xdb   : > { %s571_s0 = sshll.u32 %s3840_s18, 4  ;;  %s600_s30 = sshll.u32 %s3841_s28, 4  ;;  %s572_s0 = int_to_ptr.vmem [resolvable:$true] %s571_s0  ;;  %s601_s30 = int_to_ptr.vmem [resolvable:$true] %s600_s30 }
  0xdc   : > { %s4805_s8 = sld [smem:[#allocation43_spill]] }
  0xe2   : > { %s3563_s12 = scalar_lea.hbm %s4805_s8, 32 }
  0xe3   : > { %p3564_p1 = scmp.ne.s32.totalorder %s4805_s8, %s3563_s12  ;;  %p3570_p0 = scmp.lt.u32.totalorder %s3563_s12, %s4805_s8 }
  0xe5   : > { %p3566_p3 = pnand %p3564_p1, %p4014_p8 }
  0xe7   : > { %p3567_p13 = pneg %p3566_p3 }
  0xe9   : > { %p3572_p2 = pnand %p3570_p0, %p3567_p13 }
  0xeb   : > { %3575 = shalt.err (!%p3572_p2)
}
  0xec   : > { %s3576_s2 = scalar_lea.vmem %s572_s0, 32  ;;  %p3584_p10 = scmp.lt.s32.totalorder %s572_s0, %s572_s0 }
  0xed   : > { %p3577_p5 = scmp.ne.s32.totalorder %s572_s0, %s3576_s2  ;;  %p3585_p11 = scmp.lt.s32.totalorder %s3576_s2, %s3576_s2 }
  0xef   : > { %p3579_p7 = pnand %p3577_p5, %p4014_p8  ;;  %p3586_p12 = por %p3585_p11, %p3584_p10 }
  0xf1   : > { %p3580_p9 = pneg %p3579_p7 }
  0xf3   : > { %p3587_p4 = pnand %p3586_p12, %p3580_p9 }
  0xf5   : > { %3590 = shalt.err (!%p3587_p4)
}
  0xf6   : > { %3227 = dma.hbm_to_vmem [thread:$0]  (!%p4000_p6), %s4805_s8, 32, %s572_s0, [#allocation12], %s3834_s6, %s3834_s6, %s3835_s10  }
  0xf7   : > { %s4806_s11 = sld [smem:[#allocation46_spill]] }
  0xfd   : > { %s3591_s26 = scalar_lea.hbm %s4806_s11, 32 }
  0xfe   : > { %p3592_p1 = scmp.ne.s32.totalorder %s4806_s11, %s3591_s26  ;;  %p3598_p0 = scmp.lt.u32.totalorder %s3591_s26, %s4806_s11 }
 0x100   : > { %p3594_p3 = pnand %p3592_p1, %p4014_p8 }
 0x102   : > { %p3595_p13 = pneg %p3594_p3 }
 0x104   : > { %p3600_p2 = pnand %p3598_p0, %p3595_p13 }
 0x106   : > { %3603 = shalt.err (!%p3600_p2)
}
 0x107   : > { %s3604_s21 = scalar_lea.vmem %s601_s30, 32  ;;  %p3612_p10 = scmp.lt.s32.totalorder %s601_s30, %s601_s30 }
 0x108   : > { %p3605_p5 = scmp.ne.s32.totalorder %s601_s30, %s3604_s21  ;;  %p3613_p11 = scmp.lt.s32.totalorder %s3604_s21, %s3604_s21 }
 0x10a   : > { %p3607_p7 = pnand %p3605_p5, %p4014_p8  ;;  %p3614_p12 = por %p3613_p11, %p3612_p10 }
 0x10c   : > { %p3608_p9 = pneg %p3607_p7 }
 0x10e   : > { %p3615_p4 = pnand %p3614_p12, %p3608_p9 }
 0x110   : > { %3618 = shalt.err (!%p3615_p4)
}
 0x111   : > { %3233 = dma.hbm_to_vmem [thread:$0]  (!%p4000_p6), %s4806_s11, 32, %s601_s30, [#allocation15], %s3834_s6, %s3834_s6, %s3835_s10  }
 0x112   : > { %s3842_s2 = smov [#allocation19]   ;;  %s3843_s25 = smov [#allocation22]  }
 0x113   : > { %s629_s3 = sshll.u32 %s3842_s2, 4  ;;  %s659_s18 = sshll.u32 %s3843_s25, 4  ;;  %s630_s3 = int_to_ptr.vmem [resolvable:$true] %s629_s3  ;;  %s660_s18 = int_to_ptr.vmem [resolvable:$true] %s659_s18 }
 0x114   : > { %s3619_s29 = scalar_lea.hbm %s4742_s14, 32 }
 0x115   : > { %p3620_p1 = scmp.ne.s32.totalorder %s4742_s14, %s3619_s29  ;;  %p3626_p0 = scmp.lt.u32.totalorder %s3619_s29, %s4742_s14 }
 0x117   : > { %p3622_p3 = pnand %p3620_p1, %p4014_p8 }
 0x119   : > { %p3623_p13 = pneg %p3622_p3 }
 0x11b   : > { %p3628_p2 = pnand %p3626_p0, %p3623_p13 }
 0x11d   : > { %3631 = shalt.err (!%p3628_p2)
}
 0x11e   : > { %s3632_s30 = scalar_lea.vmem %s630_s3, 32  ;;  %p3640_p10 = scmp.lt.s32.totalorder %s630_s3, %s630_s3 }
 0x11f   : > { %p3633_p5 = scmp.ne.s32.totalorder %s630_s3, %s3632_s30  ;;  %p3641_p11 = scmp.lt.s32.totalorder %s3632_s30, %s3632_s30 }
 0x121   : > { %p3635_p7 = pnand %p3633_p5, %p4014_p8  ;;  %p3642_p12 = por %p3641_p11, %p3640_p10 }
 0x123   : > { %p3636_p9 = pneg %p3635_p7 }
 0x125   : > { %p3643_p4 = pnand %p3642_p12, %p3636_p9 }
 0x127   : > { %3646 = shalt.err (!%p3643_p4)
}
 0x128   : > { %3239 = dma.hbm_to_vmem [thread:$0]  (!%p4000_p6), %s4742_s14, 32, %s630_s3, [#allocation18], %s3834_s6, %s3834_s6, %s3835_s10  }
 0x129   : > { %s3647_s28 = scalar_lea.hbm %s4745_s17, 16 }
 0x12a   : > { %p3648_p1 = scmp.ne.s32.totalorder %s4745_s17, %s3647_s28  ;;  %p3654_p0 = scmp.lt.u32.totalorder %s3647_s28, %s4745_s17 }
 0x12c   : > { %p3650_p3 = pnand %p3648_p1, %p4014_p8 }
 0x12e   : > { %p3651_p13 = pneg %p3650_p3 }
 0x130   : > { %p3656_p2 = pnand %p3654_p0, %p3651_p13 }
 0x132   : > { %3659 = shalt.err (!%p3656_p2)
}
 0x133   : > { %s3660_s20 = scalar_lea.vmem %s660_s18, 16  ;;  %s3667_s6 = scalar_lea.vmem %s660_s18, 32 }
 0x134   : > { %p3661_p5 = scmp.ne.s32.totalorder %s660_s18, %s3660_s20  ;;  %p3668_p10 = scmp.lt.s32.totalorder %s660_s18, %s660_s18 }
 0x135   : > { %p3669_p11 = scmp.lt.s32.totalorder %s3667_s6, %s3660_s20 }
 0x136   : > { %p3663_p7 = pnand %p3661_p5, %p4014_p8 }
 0x137   : > { %p3670_p12 = por %p3669_p11, %p3668_p10 }
 0x138   : > { %p3664_p9 = pneg %p3663_p7 }
 0x13a   : > { %p3671_p4 = pnand %p3670_p12, %p3664_p9 }
 0x13c   : > { %3674 = shalt.err (!%p3671_p4)
}
 0x13d   : > { %s4807_s27 = sld [smem:[#allocation33_spill]]  ;;  %s2755_s21 = sadd.s32 4294967294, %s3829_s24  }
 0x13e   : > { %3245 = dma.hbm_to_vmem [thread:$0]  (!%p4000_p6), %s4745_s17, 16, %s660_s18, [#allocation21]  }
 0x13f   : > { %s4253_s4 = sadd.s32 1, %s3829_s24   ;;  %s51_s30 = sadd.s32 1, %s3825_s23 }
 0x140   : > { %s48_s0 = ssub.s32 %s3829_s24, %s4253_s4  ;;  %p58_p8 = scmp.ne.s32.totalorder %s3825_s23, %s3821_s22 }
 0x141   : > { %p49_p1 = scmp.eq.s32.totalorder %s48_s0, 0  ;;  %p59_p3 = scmp.eq.s32.totalorder %s3829_s24, 0 }
 0x142   : > { %p64_p13 = scmp.ne.s32.totalorder %s3821_s22, %s3817_s1  ;;  %p498_p9 = scmp.eq.s32.totalorder %s2755_s21, 1 }
 0x143   : > { %p492_p0 = scmp.eq.s32.totalorder %s4807_s27, 1  ;;  %p60_p2 = por %p59_p3, %p58_p8 }
 0x144   : > { %s4265_s19 = scalar_select %p49_p1, %s3825_s23, %s51_s30  }
 0x145   : > { %p4808_p5 = scmp.eq.s32.totalorder %s4807_s27, 0  ;;  %p4273_p6 = por %p492_p0, %p58_p8 }
 0x146   : > { %p3268_p10 = scmp.lt.s32.totalorder %s3829_s24, 2  ;;  %s4279_s25 = sand.u32 1, %s3825_s23  }
 0x147   : > { %p4269_p7 = por %p4808_p5, %p64_p13  ;;  %p4281_p11 = por %p498_p9, %p64_p13 }
 0x148   : > { %s4810_s2 = scalar_select %p4273_p6, 1, 0 }
 0x149   : > { %s4809_s18 = scalar_select %p4269_p7, 1, 0 }
 0x14a   : > { %s4811_s28 = scalar_select %p4281_p11, 1, 0 }
 0x14b   : > { %s2769_s26 = sshll.u32 %s4279_s25, 3  ;;  %s2770_s29 = sshll.u32 %s3829_s24, 7 }
 0x14c   : > { %s4812_s20 = sld [smem:[#allocation35_spill]]  ;;  %s680_s10 = scalar_lea.vmem [#allocation2], %s2769_s26 }
 0x14d   : > { %s687_s3 = sshll.u32 %s680_s10, 4  ;;  %p4292_p12 = pnand %p3268_p10, %p60_p2  ;;  %s4296_s3 = int_to_ptr.vmem [resolvable:$true] %s687_s3 }
 0x14e   : > { %s677_s30 = scalar_lea.sflag [#allocation3], %s4279_s25 }
 0x14f   : > { %p3677_p8 = pneg %p4292_p12 }
 0x152   : > { %s4290_s6 = scalar_lea.hbm %s4812_s20, %s2770_s29  ;;  %s3680_s12 = scalar_lea.hbm %s4812_s20, 256 }
 0x153   : > { %s3675_s0 = scalar_lea.hbm %s4290_s6, 128  ;;  %p3681_p13 = scmp.lt.u32.totalorder %s4290_s6, %s4812_s20 }
 0x154   : > { %p3676_p4 = scmp.ne.s32.totalorder %s4290_s6, %s3675_s0  ;;  %p3682_p0 = scmp.lt.u32.totalorder %s3680_s12, %s3675_s0 }
 0x155   : > { %p3684_p5 = scmp.lt.u32.totalorder %s3675_s0, %s4290_s6 }
 0x156   : > { %p3678_p1 = pnand %p3677_p8, %p3676_p4  ;;  %p3683_p2 = por %p3682_p0, %p3681_p13 }
 0x158   : > { %p3679_p3 = pneg %p3678_p1  ;;  %p3685_p9 = por %p3684_p5, %p3683_p2 }
 0x15a   : > { %p3686_p10 = pnand %p3685_p9, %p3679_p3 }
 0x15c   : > { %3689 = shalt.err (!%p3686_p10)
}
 0x15d   : > { %s3690_s21 = scalar_lea.vmem %s4296_s3, 128  ;;  %s3844_s26 = smov [#allocation2]  }
 0x15e   : > { %p3691_p4 = scmp.ne.s32.totalorder %s4296_s3, %s3690_s21  ;;  %s3695_s29 = sshll.u32 %s3844_s26, 4  ;;  %s3696_s29 = int_to_ptr.vmem [resolvable:$false] %s3695_s29 }
 0x15f   : > { %s3697_s16 = scalar_lea.vmem %s3696_s29, 256  ;;  %p3698_p6 = scmp.lt.s32.totalorder %s4296_s3, %s3696_s29 }
 0x160   : > { %p3693_p1 = pnand %p3691_p4, %p3677_p8  ;;  %p3699_p13 = scmp.lt.s32.totalorder %s3697_s16, %s3690_s21 }
 0x162   : > { %p3694_p11 = pneg %p3693_p1  ;;  %p3700_p0 = por %p3699_p13, %p3698_p6 }
 0x164   : > { %p3701_p2 = pnand %p3700_p0, %p3694_p11 }
 0x166   : > { %3704 = shalt.err (!%p3701_p2)
}
 0x167   : > { %3249 = dma.hbm_to_vmem [thread:$0]  (!%p4292_p12), %s4290_s6, 128, %s4296_s3, %s677_s30  }
 0x168   : > { %s2771_s0 = sshll.u32 %s3829_s24, 4  ;;  %s4814_s26 = sld [smem:[#allocation36_spill]] }
 0x169   : > { %s697_s21 = scalar_lea.vmem [#allocation5], %s4279_s25  ;;  %s4815_s16 = sand.u32 1, %s3829_s24  }
 0x16a   : > { %s704_s29 = sshll.u32 %s697_s21, 4  ;;  %s695_s7 = scalar_lea.sflag [#allocation6], %s4815_s16  ;;  %s705_s29 = int_to_ptr.vmem [resolvable:$true] %s704_s29 }
 0x16e   : > { %s4329_s5 = scalar_lea.hbm %s4814_s26, %s2771_s0  ;;  %s3710_s30 = scalar_lea.hbm %s4814_s26, 32 }
 0x16f   : > { %s3705_s8 = scalar_lea.hbm %s4329_s5, 16  ;;  %p3711_p5 = scmp.lt.u32.totalorder %s4329_s5, %s4814_s26 }
 0x170   : > { %p3706_p6 = scmp.ne.s32.totalorder %s4329_s5, %s3705_s8  ;;  %p3712_p9 = scmp.lt.u32.totalorder %s3710_s30, %s3705_s8 }
 0x171   : > { %p3714_p4 = scmp.lt.u32.totalorder %s3705_s8, %s4329_s5 }
 0x172   : > { %p3708_p11 = pnand %p3706_p6, %p3677_p8  ;;  %p3713_p10 = por %p3712_p9, %p3711_p5 }
 0x174   : > { %p3709_p3 = pneg %p3708_p11  ;;  %p3715_p1 = por %p3714_p4, %p3713_p10 }
 0x176   : > { %p3716_p13 = pnand %p3715_p1, %p3709_p3 }
 0x178   : > { %3719 = shalt.err (!%p3716_p13)
}
 0x179   : > { %s3720_s25 = scalar_lea.vmem %s705_s29, 16  ;;  %s3845_s10 = smov [#allocation5]  }
 0x17a   : > { %p3721_p0 = scmp.ne.s32.totalorder %s705_s29, %s3720_s25  ;;  %s3725_s21 = sshll.u32 %s3845_s10, 4  ;;  %s3726_s21 = int_to_ptr.vmem [resolvable:$false] %s3725_s21 }
 0x17b   : > { %s3727_s16 = scalar_lea.vmem %s3726_s21, 32  ;;  %p3728_p11 = scmp.lt.s32.totalorder %s705_s29, %s3726_s21 }
 0x17c   : > { %p3723_p2 = pnand %p3721_p0, %p3677_p8  ;;  %p3729_p7 = scmp.lt.s32.totalorder %s3727_s16, %s3720_s25 }
 0x17e   : > { %p3724_p6 = pneg %p3723_p2  ;;  %p3730_p5 = por %p3729_p7, %p3728_p11 }
 0x180   : > { %p3731_p9 = pnand %p3730_p5, %p3724_p6 }
 0x182   : > { %3734 = shalt.err (!%p3731_p9)
}
 0x183   : > { %3252 = dma.hbm_to_vmem [thread:$0]  (!%p4292_p12), %s4329_s5, 16, %s705_s29, %s695_s7  }
 0x184   : > { %s4816_s8 = sld [smem:[#allocation34_spill]] }
 0x18a   : > { %p4817_p3 = scmp.ne.s32.totalorder %s4816_s8, 0 }
 0x18b   : > { %s4356_s6 = sand.u32 (!%p4817_p3), 1, %s3821_s22   ;;  %p4818_p8 = scmp.ne.s32.totalorder (!%p4817_p3), %s4809_s18, 0 }
 0x18c   : > { %713 = sbr.rel (%p4817_p3) target bundleno = 6181 (0x1825), region = 100  ;;  %s2773_s3 = sshll.u32 (!%p4817_p3), %s4356_s6, 3 }
 0x18d   : > { %s716_s30 = scalar_lea.sflag (!%p4817_p3), [#allocation3], %s4356_s6  ;;  %s719_s0 = scalar_lea.vmem (!%p4817_p3), [#allocation2], %s2773_s3 }
 0x193   : > { %3780 = dma.done.wait (%p4818_p8), %s716_s30, 128  }
 0x194   : > { %3782 = vsyncadd (%p4818_p8), %s716_s30, 4294967168  ;;  %s4819_s27 = sld [smem:[#allocation33_spill]]  ;;  %s727_s29 = scalar_lea.vmem [#allocation5], %s4356_s6 }
 0x19a   : > { %s724_s5 = sand.u32 1, %s4819_s27  }
 0x19b   : > { %s725_s7 = scalar_lea.sflag [#allocation6], %s724_s5 }
 0x19c   : > { %3784 = dma.done.wait (%p4818_p8), %s725_s7, 16  }
 0x19d   : > { %3786 = vsyncadd (%p4818_p8), %s725_s7, 4294967280  ;;  %p4820_p7 = scmp.eq.s32.totalorder %s4819_s27, 0 }
 0x19f   : > { %3788 = dma.done.wait (%p4820_p7), [#allocation6], 16   ;;  %p4821_p12 = pmov %p4820_p7 }
 0x1a0   : > { %p4822_p10 = pmov %p4820_p7 }
 0x1a1   : > { %3790 = vsyncadd (%p4821_p12), [#allocation6], 4294967280 }
 0x1a2   : > { %3792 = dma.done.wait (%p4822_p10), [#allocation9], 48   ;;  %p4823_p4 = pmov %p4820_p7 }
 0x1a4   : > { %3794 = vsyncadd (%p4823_p4), [#allocation9], 4294967248  ;;  %p4824_p1 = pmov %p4823_p4 }
 0x1a6   : > { %3796 = dma.done.wait (%p4824_p1), [#allocation12], 64   ;;  %p4825_p13 = pmov %p4824_p1 }
 0x1a7   : > { %p4826_p0 = pmov %p4824_p1 }
 0x1a8   : > { %3798 = vsyncadd (%p4825_p13), [#allocation12], 4294967232 }
 0x1a9   : > { %3800 = dma.done.wait (%p4826_p0), [#allocation15], 64   ;;  %p4827_p2 = pmov %p4826_p0 }
 0x1aa   : > { %p4828_p6 = pmov %p4826_p0 }
 0x1ab   : > { %3802 = vsyncadd (%p4827_p2), [#allocation15], 4294967232 }
 0x1ac   : > { %3804 = dma.done.wait (%p4828_p6), [#allocation18], 64   ;;  %p4829_p11 = pmov %p4826_p0 }
 0x1ad   : > { %p4830_p5 = pmov %p4826_p0 }
 0x1ae   : > { %3806 = vsyncadd (%p4829_p11), [#allocation18], 4294967232 }
 0x1af   : > { %3808 = dma.done.wait (%p4830_p5), [#allocation21], 48   ;;  %p4831_p9 = pmov %p4826_p0 }
 0x1b0   : > { %vm834_vm0 = vcmask 261120   ;;  %v831_v0 = vld [vmem:[%s719_s0] sm:$0xff]  ;;  %s4832_s25 = sld [smem:[#allocation39_spill]]  ;;  %v3846_v10 = vmov 0.0|0.0   ;;  %vm3847_vm1 = vmmov 0   ;;  %v3848_v13 = vmov 0.0  }
 0x1b1   : > { %3810 = vsyncadd (%p4831_p9), [#allocation21], 4294967248  ;;  %v835_v1 = vsel %vm834_vm0, %v831_v0, 0.0  ;;  %3090 = vmatprep.subr.bf16.mxu0 %v3846_v10  ;;  %2932 = vmatprep.mubr.msk.f32.mxu0 %vm3847_vm1, %v3848_v13  ;;  %v2785_v19 = vld [vmem:[#allocation7] ss:$0 sm:$0xff]  ;;  %s4773_s0 = smov 112   ;;  %v1030_v31 = vlaneseq }
 0x1b2   : > { %836 = vadd.xlane.f32.xlu0 %v835_v1  ;;  %2935 = vmatprep.subr.mxu1 %v3848_v13  ;;  %v2786_v21 = vld [vmem:[#allocation8] ss:$0 sm:$0xff]  ;;  %v2787_v24 = vld [vmem:[#allocation10] ss:$0 sm:$0xff]  ;;  %s4774_s5 = smov 96   ;;  %s4775_s7 = smov 80  }
 0x1b3   : > { %2937 = vmatprep.mubr.msk.f32.mxu1 %vm3847_vm1, %v3848_v13  ;;  %vm953_vm2 = vcmask 130048   ;;  %v863_v32 = vld [vmem:[%s727_s29] sm:$0x1]  ;;  %v1031_v34 = vshrl.u32 %v1030_v31, 7  ;;  %vm1036_vm3 = vcmask 64512   ;;  %s4770_s29 = smov 48  }
 0x1b4   : > { %v864_v33 = vsub.f32 1.0, %v863_v32  ;;  %s4771_s18 = smov 64   ;;  %s4833_s21 = sld [smem:[#allocation41_spill]]  ;;  %vm1518_vm4 = vcmask 523264   ;;  %vm2550_vm5 = vcmask 16384  }
 0x1b5   : > { %v1032_v36 = vsub.s32 0, %v1031_v34  ;;  %s4772_s12 = smov 16   ;;  %s4834_s10 = sld [smem:[#allocation45_spill]] }
 0x1b6   : > { %v866_v7 = vld [vmem:[%s4832_s25] sm:$0xff]  ;;  %v867_v8 = vld [vmem:[%s4832_s25 + $0x8] sm:$0xff]  ;;  %v868_v9 = vld [vmem:[%s4832_s25 + $0x10] sm:$0xff]  ;;  %v865_v35 = vmul.f32 -10000.0, %v864_v33  ;;  %s4836_s3 = smov 80   ;;  %s4838_s30 = smov 112  }
 0x1b7   : > { %v3091_v11 = vpack.c.bf16 %v867_v8, %v866_v7  ;;  %v869_v12 = vld [vmem:[%s4832_s25 + $0x18] sm:$0xff]  ;;  %s4844_s16 = sld [smem:[#allocation50_spill]]  ;;  %s2847_s9 = sshll.u32 %s4819_s27, 4 }
 0x1b8   : > { %v3094_v14 = vpack.c.bf16 %v869_v12, %v868_v9  ;;  %v4437_v37 = vrot.slane %v865_v35, %v1032_v36  ;;  %s830_s8 = scalar_lea.vmem [#allocation23], %s4356_s6  ;;  %p4846_p8 = scmp.ne.s32.totalorder %s4810_s2, 0 }
 0x1b9   : > { %3092 = vmatpush3.bf16.msra.mxu0 %v3091_v11  ;;  %s3855_s27 = smov [#allocation23]  }
 0x1ba   : > { %3093 = vmatprep.subr.bf16.mxu0 %v3846_v10 }
 0x1bb   : > { %v1413_v31 = vld [vmem:[%s4834_s10 + $0x18] sm:$0xff] }
 0x1bd   : > { %3095 = vmatpush3.bf16.msra.mxu0 %v3094_v14 }
 0x1be   : > { %2945 = vmatprep.subr.mxu0 %v3848_v13 }
 0x23f   : > { %v837_v2 = vpop.xlane.xlu0 %836 }
 0x240   : > { %v839_v3 = vmul.f32 0.03125, %v837_v2  ;;  %v1296_v2 = vld [vmem:[%s4833_s21] sm:$0xff] }
 0x242   : > { %v840_v4 = vsub.f32 %v831_v0, %v839_v3  ;;  %v1297_v3 = vld [vmem:[%s4833_s21 + $0x8] sm:$0xff] }
 0x244   : > { %v841_v5 = vmul.f32 %v840_v4, %v840_v4 }
 0x246   : > { %v842_v6 = vsel %vm834_vm0, %v841_v5, 0.0  ;;  %v3097_v5 = vpack.c.bf16 %v1297_v3, %v1296_v2 }
 0x247   : > { %843 = vadd.xlane.f32.xlu0 %v842_v6  ;;  %v1299_v6 = vld [vmem:[%s4833_s21 + $0x18] sm:$0xff] }
 0x2d4   : > { %v844_v15 = vpop.xlane.xlu0 %843 }
 0x2d5   : > { %v845_v16 = vmul.f32 0.03125, %v844_v15 }
 0x2d7   : > { %v846_v17 = vadd.f32 1e-12, %v845_v16  ;;  %v2795_v16 = vld [vmem:[#allocation11] ss:$0 sm:$0xff] }
 0x2d9   : > { %3335 = vrsqrt.f32 %v846_v17 }
 0x2e3   : > { %v3336_v18 = vpop.eup %3335 }
 0x2e4   : > { %v848_v20 = vmul.f32 %v3336_v18, %v840_v4  ;;  %v1298_v4 = vld [vmem:[%s4833_s21 + $0x10] sm:$0xff] }
 0x2e5   : > { %v3100_v7 = vpack.c.bf16 %v1299_v6, %v1298_v4  ;;  %v2801_v4 = vld [vmem:[#allocation17] ss:$0 sm:$0xff] }
 0x2e6   : > { %v855_v22 = vmul.f32 %v2785_v19, %v848_v20 }
 0x2e8   : > { %v4416_v23 = vadd.f32 %v2786_v21, %v855_v22 }
 0x2ea   : > { %2933 = vmatmul.mubr.msk.f32.vlgmr.msra.gmra.mrb[0].mxu0 %vm834_vm0, %v4416_v23 }
 0x2eb   : > { %2947 = vmatprep.mubr.msk.f32.mxu0 %vm3847_vm1, %v3848_v13 }
 0x3bd   : > { %v946_v25 = vpop.f32.mrb[0].mxu0 }
 0x3be   : > { %v947_v26 = vadd.f32 %v2787_v24, %v946_v25  ;;  %v2934_v27 = vpop.f32.mrb[1].mxu0 }
 0x3c0   : > { %1124 = vrot.lane.b32.xlu0 %v947_v26, %s4773_s0  ;;  %951 = vrot.lane.b32.xlu1 %v947_v26, %s4774_s5  ;;  %s4839_s0 = smov 64   ;;  %s2565_s5 = sshll.u32 %s830_s8, 4  ;;  %s4686_s5 = int_to_ptr.vmem [resolvable:$true] %s2565_s5 }
 0x3c4   : > { %1126 = vrot.lane.b32.xlu1 %v947_v26, %s4775_s7  ;;  %s4837_s7 = smov 96  }
 0x432   : > { %v952_v28 = vpop.permute.xlu1 %951  ;;  %v1125_v30 = vpop.permute.xlu0 %1124 }
 0x433   : > { %2936 = vmatpush3.xpose.msk.msra.mxu1 %vm953_vm2, %v952_v28  ;;  %v1410_v28 = vld [vmem:[%s4834_s10] sm:$0xff] }
 0x434   : > { %2940 = vmatprep.subr.mxu1 %v3848_v13 }
 0x436   : > { %2938 = vmatmul.mubr.msk.f32.vlgmr.msra.gmra.mrb[0].mxu1 %vm953_vm2, %v947_v26  ;;  %v1127_v29 = vpop.permute.xlu1 %1126 }
 0x437   : > { %2946 = vmatpush3.xpose.msk.msra.mxu0 %vm953_vm2, %v1127_v29  ;;  %2942 = vmatprep.mubr.msk.f32.mxu1 %vm3847_vm1, %v3848_v13  ;;  %v1411_v29 = vld [vmem:[%s4834_s10 + $0x8] sm:$0xff] }
 0x438   : > { %3096 = vmatprep.subr.bf16.mxu0 %v3846_v10 }
 0x43a   : > { %2948 = vmatmul.mubr.msk.f32.vlgmr.msra.gmra.mrb[2].mxu0 %vm953_vm2, %v1125_v30  ;;  %v3103_v30 = vpack.c.bf16 %v1411_v29, %v1410_v28  ;;  %v2803_v28 = vld [vmem:[#allocation19] ss:$0 sm:$0xff] }
 0x43b   : > { %2963 = vmatprep.mubr.msk.f32.mxu0 %vm3847_vm1, %v3848_v13  ;;  %3098 = vmatpush3.bf16.msra.mxu0 %v3097_v5 }
 0x43c   : > { %3099 = vmatprep.subr.bf16.mxu0 %v3846_v10 }
 0x43f   : > { %3101 = vmatpush3.bf16.msra.mxu0 %v3100_v7 }
 0x440   : > { %3108 = vmatprep.subr.bf16.mxu0 %v3846_v10 }
 0x509   : > { %v1024_v38 = vpop.f32.mrb[0].mxu1 }
 0x50a   : > { %v1028_v39 = vmul.f32 0.25, %v1024_v38  ;;  %v2939_v40 = vpop.f32.mrb[1].mxu1  ;;  %v2797_v38 = vld [vmem:[#allocation13] ss:$0 sm:$0xff] }
 0x50b   : > { %v2798_v40 = vld [vmem:[#allocation14] ss:$0 sm:$0xff] }
 0x50c   : > { %v1035_v41 = vadd.f32 %v4437_v37, %v1028_v39 }
 0x50d   : > { %v1198_v42 = vpop.f32.mrb[2].mxu0 }
 0x50e   : > { %v1202_v43 = vmul.f32 0.25, %v1198_v42  ;;  %v2949_v44 = vpop.f32.mrb[3].mxu0  ;;  %v1037_v45 = vsel %vm1036_vm3, %v1035_v41, -inf }
 0x50f   : > { %1038 = vmax.xlane.f32.xlu1 %v1037_v45 }
 0x510   : > { %v1203_v46 = vadd.f32 %v1202_v43, %v4437_v37 }
 0x512   : > { %v1204_v47 = vsel %vm1036_vm3, %v1203_v46, -inf }
 0x513   : > { %1205 = vmax.xlane.f32.xlu0 %v1204_v47 }
 0x529   : > { %1215 = vrot.lane.b32.xlu0 %v947_v26, %s4770_s29  ;;  %s4835_s29 = sld [smem:[#allocation47_spill]] }
 0x52f   : > { %v1503_v43 = vld [vmem:[%s4835_s29] sm:$0xff]  ;;  %v1504_v44 = vld [vmem:[%s4835_s29 + $0x8] sm:$0xff]  ;;  %v1506_v47 = vld [vmem:[%s4835_s29 + $0x18] sm:$0xff] }
 0x530   : > { %v3109_v45 = vpack.c.bf16 %v1504_v44, %v1503_v43 }
 0x59c   : > { %v1039_v48 = vpop.xlane.xlu1 %1038 }
 0x59d   : > { %v1040_v49 = vsub.f32 %v1035_v41, %v1039_v48 }
 0x59f   : > { %v1041_v50 = vmul.f32 1.442695, %v1040_v49  ;;  %v1507_v49 = vld [vmem:[%s4835_s29 + $0x20] sm:$0xff] }
 0x5a0   : > { %v1206_v51 = vpop.xlane.xlu0 %1205 }
 0x5a1   : > { %3337 = vpow2.f32 %v1041_v50  ;;  %v1207_v52 = vsub.f32 %v1203_v46, %v1206_v51  ;;  %v1505_v46 = vld [vmem:[%s4835_s29 + $0x10] sm:$0xff]  ;;  %v1508_v50 = vld [vmem:[%s4835_s29 + $0x28] sm:$0xff] }
 0x5a2   : > { %v3112_v48 = vpack.c.bf16 %v1506_v47, %v1505_v46  ;;  %v3115_v51 = vpack.c.bf16 %v1508_v50, %v1507_v49 }
 0x5a3   : > { %v1208_v53 = vmul.f32 1.442695, %v1207_v52  ;;  %v1509_v52 = vld [vmem:[%s4835_s29 + $0x30] sm:$0xff] }
 0x5a4   : > { %v1216_v63 = vpop.permute.xlu0 %1215 }
 0x5a5   : > { %3339 = vpow2.f32 %v1208_v53  ;;  %v1510_v53 = vld [vmem:[%s4835_s29 + $0x38] sm:$0xff] }
 0x5ab   : > { %v3338_v54 = vpop.eup %3337 }
 0x5ac   : > { %v1043_v55 = vsel %vm1036_vm3, %v3338_v54, 0.0 }
 0x5ad   : > { %1044 = vadd.xlane.f32.xlu1 %v1043_v55  ;;  %v2799_v55 = vld [vmem:[#allocation16] ss:$0 sm:$0xff] }
 0x5af   : > { %v3340_v56 = vpop.eup %3339 }
 0x5b0   : > { %v1210_v57 = vsel %vm1036_vm3, %v3340_v56, 0.0 }
 0x5b1   : > { %1211 = vadd.xlane.f32.xlu1 %v1210_v57 }
 0x5c2   : > { %1048 = vrot.lane.b32.xlu1 %v947_v26, %s4771_s18  ;;  %s4843_s18 = sld [smem:[#allocation49_spill]] }
 0x63a   : > { %v1045_v58 = vpop.xlane.xlu1 %1044 }
 0x63b   : > { %3341 = vrcp.f32 %v1045_v58 }
 0x63e   : > { %v1212_v59 = vpop.xlane.xlu1 %1211 }
 0x63f   : > { %3343 = vrcp.f32 %v1212_v59 }
 0x642   : > { %v1049_v60 = vpop.permute.xlu1 %1048 }
 0x643   : > { %2941 = vmatpush3.msra.mxu1 %v1049_v60 }
 0x644   : > { %2950 = vmatprep.subr.mxu1 %v3848_v13 }
 0x645   : > { %v3342_v61 = vpop.eup %3341 }
 0x646   : > { %v1047_v62 = vmul.f32 %v3342_v61, %v3338_v54  ;;  %v3118_v54 = vpack.c.bf16 %v1510_v53, %v1509_v52 }
 0x648   : > { %2943 = vmatmul.mubr.msk.f32.vlgmr.msra.gmra.mrb[2].mxu1 %vm1036_vm3, %v1047_v62 }
 0x649   : > { %v3344_v0 = vpop.eup %3343  ;;  %2951 = vmatpush3.msra.mxu1 %v1216_v63  ;;  %2952 = vmatprep.mubr.msk.f32.mxu1 %vm3847_vm1, %v3848_v13 }
 0x64a   : > { %v1214_v1 = vmul.f32 %v3344_v0, %v3340_v56  ;;  %3102 = vmatprep.subr.bf16.mxu1 %v3846_v10 }
 0x64c   : > { %2953 = vmatmul.mubr.msk.f32.vlgmr.msra.gmra.mrb[4].mxu1 %vm1036_vm3, %v1214_v1 }
 0x64d   : > { %2974 = vmatprep.mubr.msk.f32.mxu1 %vm3847_vm1, %v3848_v13  ;;  %3104 = vmatpush3.bf16.msra.mxu1 %v3103_v30  ;;  %v2804_v30 = vld [vmem:[#allocation20] ss:$0 sm:$0xff] }
 0x64e   : > { %3105 = vmatprep.subr.bf16.mxu1 %v3846_v10 }
 0x71b   : > { %v1120_v8 = vpop.f32.mrb[2].mxu1 }
 0x71c   : > { %v2944_v9 = vpop.f32.mrb[3].mxu1 }
 0x71f   : > { %v1287_v11 = vpop.f32.mrb[4].mxu1 }
 0x720   : > { %1292 = vrot.lane.b32.xlu1 %v1287_v11, %s4772_s12  ;;  %v2954_v12 = vpop.f32.mrb[5].mxu1  ;;  %s4840_s12 = smov 48  }
 0x792   : > { %v1293_v14 = vpop.permute.xlu1 %1292 }
 0x793   : > { %v1295_v15 = vsel %vm953_vm2, %v1120_v8, %v1293_v14 }
 0x794   : > { %2964 = vmatmul.mubr.msk.f32.vlgmr.msra.gmra.mrb[4].mxu0 %vm834_vm0, %v1295_v15 }
 0x795   : > { %2993 = vmatprep.mubr.msk.f32.mxu0 %vm3847_vm1, %v3848_v13  ;;  %3110 = vmatpush3.bf16.msra.mxu0 %v3109_v45 }
 0x796   : > { %3111 = vmatprep.subr.bf16.mxu0 %v3846_v10 }
 0x799   : > { %3113 = vmatpush3.bf16.msra.mxu0 %v3112_v48 }
 0x79a   : > { %3114 = vmatprep.subr.bf16.mxu0 %v3846_v10 }
 0x79d   : > { %3116 = vmatpush3.bf16.msra.mxu0 %v3115_v51 }
 0x79e   : > { %3117 = vmatprep.subr.bf16.mxu0 %v3846_v10 }
 0x7a1   : > { %3119 = vmatpush3.bf16.msra.mxu0 %v3118_v54 }
 0x7a2   : > { %3017 = vmatprep.subr.mxu0 %v3848_v13 }
 0x867   : > { %v1376_v17 = vpop.f32.mrb[4].mxu0 }
 0x868   : > { %v1377_v18 = vadd.f32 %v2795_v16, %v1376_v17  ;;  %v2965_v19 = vpop.f32.mrb[5].mxu0  ;;  %v2805_v17 = vld [vmem:[%s4832_s25 + $0x20] sm:$0xff] }
 0x86a   : > { %v1380_v20 = vadd.f32 %v1377_v18, %v4416_v23  ;;  %v1412_v23 = vld [vmem:[%s4834_s10 + $0x10] sm:$0xff]  ;;  %v2806_v18 = vld [vmem:[%s4832_s25 + $0x28] sm:$0xff] }
 0x86b   : > { %v3106_v32 = vpack.c.bf16 %v1413_v31, %v1412_v23  ;;  %v3121_v19 = vpack.c.bf16 %v2806_v18, %v2805_v17  ;;  %v2821_v17 = vld [vmem:[#allocation11 + $0x1] ss:$0 sm:$0xff] }
 0x86c   : > { %v1383_v21 = vsel %vm834_vm0, %v1380_v20, 0.0 }
 0x86d   : > { %1384 = vadd.xlane.f32.xlu1 %v1383_v21  ;;  %3107 = vmatpush3.bf16.msra.mxu1 %v3106_v32  ;;  %v2808_v21 = vld [vmem:[%s4832_s25 + $0x38] sm:$0xff]  ;;  %v2809_v32 = vld [vmem:[#allocation10 + $0x1] ss:$0 sm:$0xff] }
 0x86e   : > { %3120 = vmatprep.subr.bf16.mxu1 %v3846_v10 }
 0x8fa   : > { %v1385_v22 = vpop.xlane.xlu1 %1384 }
 0x8fb   : > { %v1386_v24 = vmul.f32 0.03125, %v1385_v22 }
 0x8fd   : > { %v1387_v25 = vsub.f32 %v1380_v20, %v1386_v24  ;;  %v2807_v20 = vld [vmem:[%s4832_s25 + $0x30] sm:$0xff] }
 0x8fe   : > { %v3124_v22 = vpack.c.bf16 %v2808_v21, %v2807_v20 }
 0x8ff   : > { %v1388_v26 = vmul.f32 %v1387_v25, %v1387_v25 }
 0x901   : > { %v1389_v27 = vsel %vm834_vm0, %v1388_v26, 0.0 }
 0x902   : > { %1390 = vadd.xlane.f32.xlu0 %v1389_v27 }
 0x98f   : > { %v1391_v33 = vpop.xlane.xlu0 %1390 }
 0x990   : > { %v1392_v34 = vmul.f32 0.03125, %v1391_v33 }
 0x992   : > { %v1393_v35 = vadd.f32 1e-12, %v1392_v34 }
 0x994   : > { %3345 = vrsqrt.f32 %v1393_v35 }
 0x99e   : > { %v3346_v36 = vpop.eup %3345 }
 0x99f   : > { %v1395_v39 = vmul.f32 %v3346_v36, %v1387_v25 }
 0x9a1   : > { %v1402_v41 = vmul.f32 %v2797_v38, %v1395_v39 }
 0x9a3   : > { %v1409_v42 = vadd.f32 %v2798_v40, %v1402_v41 }
 0x9a5   : > { %2975 = vmatmul.mubr.msk.f32.vlgmr.msra.gmra.mrb[6].mxu1 %vm834_vm0, %v1409_v42 }
 0x9a6   : > { %3004 = vmatprep.mubr.msk.f32.mxu1 %vm3847_vm1, %v3848_v13  ;;  %3122 = vmatpush3.bf16.msra.mxu1 %v3121_v19 }
 0x9a7   : > { %3123 = vmatprep.subr.bf16.mxu1 %v3846_v10 }
 0x9aa   : > { %3125 = vmatpush3.bf16.msra.mxu1 %v3124_v22 }
 0x9ab   : > { %3007 = vmatprep.subr.mxu1 %v3848_v13 }
 0xa78   : > { %v1490_v56 = vpop.f32.mrb[6].mxu1 }
 0xa79   : > { %v1491_v57 = vadd.f32 %v2799_v55, %v1490_v56  ;;  %v2976_v58 = vpop.f32.mrb[7].mxu1 }
 0xa7b   : > { %v1495_v59 = vmul.f32 0.044715, %v1491_v57  ;;  %v1494_v1 = vmul.f32 0.5, %v1491_v57 }
 0xa7d   : > { %v1496_v60 = vmul.f32 %v1495_v59, %v1491_v57 }
 0xa7f   : > { %v1497_v61 = vmul.f32 %v1496_v60, %v1491_v57 }
 0xa81   : > { %v1498_v62 = vadd.f32 %v1497_v61, %v1491_v57 }
 0xa83   : > { %v1499_v63 = vmul.f32 0.7978846, %v1498_v62 }
 0xa85   : > { %3347 = vtanh.f32 %v1499_v63 }
 0xa8f   : > { %v3348_v0 = vpop.eup %3347 }
 0xa90   : > { %v1501_v2 = vadd.f32 1.0, %v3348_v0 }
 0xa92   : > { %v1502_v3 = vmul.f32 %v1501_v2, %v1494_v1 }
 0xa94   : > { %2994 = vmatmul.mubr.msk.f32.vlgmr.msra.gmra.mrb[6].mxu0 %vm1518_vm4, %v1502_v3  ;;  %v2817_v3 = vld [vmem:[%s4833_s21 + $0x20] sm:$0xff] }
 0xa95   : > { %3019 = vmatprep.mubr.msk.f32.mxu0 %vm3847_vm1, %v3848_v13 }
 0xb67   : > { %v1588_v5 = vpop.f32.mrb[6].mxu0 }
 0xb68   : > { %v1589_v6 = vadd.f32 %v2801_v4, %v1588_v5  ;;  %v2995_v7 = vpop.f32.mrb[7].mxu0  ;;  %v2818_v4 = vld [vmem:[%s4833_s21 + $0x28] sm:$0xff]  ;;  %v2819_v5 = vld [vmem:[%s4833_s21 + $0x30] sm:$0xff] }
 0xb69   : > { %v2820_v7 = vld [vmem:[%s4833_s21 + $0x38] sm:$0xff] }
 0xb6a   : > { %v1592_v8 = vadd.f32 %v1589_v6, %v1409_v42  ;;  %v3127_v6 = vpack.c.bf16 %v2818_v4, %v2817_v3  ;;  %v2839_v4 = vld [vmem:[#allocation17 + $0x1] ss:$0 sm:$0xff] }
 0xb6c   : > { %v1595_v9 = vsel %vm834_vm0, %v1592_v8, 0.0 }
 0xb6d   : > { %1596 = vadd.xlane.f32.xlu1 %v1595_v9 }
 0xbfa   : > { %v1597_v11 = vpop.xlane.xlu1 %1596 }
 0xbfb   : > { %v1598_v12 = vmul.f32 0.03125, %v1597_v11 }
 0xbfd   : > { %v1599_v14 = vsub.f32 %v1592_v8, %v1598_v12  ;;  %v3130_v8 = vpack.c.bf16 %v2820_v7, %v2819_v5 }
 0xbff   : > { %v1600_v15 = vmul.f32 %v1599_v14, %v1599_v14 }
 0xc01   : > { %v1601_v16 = vsel %vm834_vm0, %v1600_v15, 0.0 }
 0xc02   : > { %1602 = vadd.xlane.f32.xlu1 %v1601_v16 }
 0xc8f   : > { %v1603_v24 = vpop.xlane.xlu1 %1602 }
 0xc90   : > { %v1604_v25 = vmul.f32 0.03125, %v1603_v24 }
 0xc92   : > { %v1605_v26 = vadd.f32 1e-12, %v1604_v25 }
 0xc94   : > { %3349 = vrsqrt.f32 %v1605_v26 }
 0xc9e   : > { %v3350_v27 = vpop.eup %3349 }
 0xc9f   : > { %v1607_v29 = vmul.f32 %v3350_v27, %v1599_v14 }
 0xca1   : > { %v1614_v23 = vmul.f32 %v2803_v28, %v1607_v29  ;;  %v2825_v29 = vld [vmem:[%s4834_s10 + $0x20] sm:$0xff] }
 0xca3   : > { %v4541_v31 = vadd.f32 %v2804_v30, %v1614_v23  ;;  %v2826_v30 = vld [vmem:[%s4834_s10 + $0x28] sm:$0xff] }
 0xca4   : > { %v3133_v23 = vpack.c.bf16 %v2826_v30, %v2825_v29  ;;  %v2842_v30 = vld [vmem:[#allocation20 + $0x1] ss:$0 sm:$0xff] }
 0xca5   : > { %3005 = vmatmul.mubr.msk.f32.vlgmr.msra.gmra.mrb[8].mxu1 %vm834_vm0, %v4541_v31 }
 0xca6   : > { %3009 = vmatprep.mubr.msk.f32.mxu1 %vm3847_vm1, %v3848_v13 }
 0xd78   : > { %v1704_v33 = vpop.f32.mrb[8].mxu1 }
 0xd79   : > { %v1705_v34 = vadd.f32 %v2809_v32, %v1704_v33  ;;  %v3006_v35 = vpop.f32.mrb[9].mxu1  ;;  %v2828_v32 = vld [vmem:[%s4834_s10 + $0x38] sm:$0xff] }
 0xd7b   : > { %1876 = vrot.lane.b32.xlu1 %v1705_v34, %s4836_s3  ;;  %1709 = vrot.lane.b32.xlu0 %v1705_v34, %s4837_s7 }
 0xd7f   : > { %1874 = vrot.lane.b32.xlu1 %v1705_v34, %s4838_s30  ;;  %s2553_s30 = scalar_lea.sflag [#allocation4], %s4356_s6 }
 0xded   : > { %v1877_v36 = vpop.permute.xlu1 %1876  ;;  %v1710_v38 = vpop.permute.xlu0 %1709 }
 0xdee   : > { %3008 = vmatpush3.xpose.msk.msra.mxu1 %vm953_vm2, %v1710_v38  ;;  %3018 = vmatpush3.xpose.msk.msra.mxu0 %vm953_vm2, %v1877_v36 }
 0xdef   : > { %3012 = vmatprep.subr.mxu1 %v3848_v13  ;;  %3126 = vmatprep.subr.bf16.mxu0 %v3846_v10 }
 0xdf1   : > { %v1875_v39 = vpop.permute.xlu1 %1874  ;;  %3010 = vmatmul.mubr.msk.f32.vlgmr.msra.gmra.mrb[10].mxu1 %vm953_vm2, %v1705_v34 }
 0xdf2   : > { %3020 = vmatmul.mubr.msk.f32.vlgmr.msra.gmra.mrb[8].mxu0 %vm953_vm2, %v1875_v39  ;;  %3014 = vmatprep.mubr.msk.f32.mxu1 %vm3847_vm1, %v3848_v13  ;;  %v2823_v39 = vld [vmem:[#allocation13 + $0x1] ss:$0 sm:$0xff] }
 0xdf3   : > { %3035 = vmatprep.mubr.msk.f32.mxu0 %vm3847_vm1, %v3848_v13  ;;  %3128 = vmatpush3.bf16.msra.mxu0 %v3127_v6 }
 0xdf4   : > { %3129 = vmatprep.subr.bf16.mxu0 %v3846_v10 }
 0xdf7   : > { %3131 = vmatpush3.bf16.msra.mxu0 %v3130_v8 }
 0xdf8   : > { %3138 = vmatprep.subr.bf16.mxu0 %v3846_v10 }
 0xec4   : > { %v1781_v40 = vpop.f32.mrb[10].mxu1 }
 0xec5   : > { %v1785_v41 = vmul.f32 0.25, %v1781_v40  ;;  %v3011_v42 = vpop.f32.mrb[11].mxu1  ;;  %v1948_v43 = vpop.f32.mrb[8].mxu0 }
 0xec6   : > { %v1952_v44 = vmul.f32 0.25, %v1948_v43  ;;  %v3021_v45 = vpop.f32.mrb[9].mxu0 }
 0xec7   : > { %v1786_v46 = vadd.f32 %v1785_v41, %v4437_v37  ;;  %v2824_v41 = vld [vmem:[#allocation14 + $0x1] ss:$0 sm:$0xff]  ;;  %v2832_v45 = vld [vmem:[%s4835_s29 + $0x48] sm:$0xff] }
 0xec8   : > { %v1953_v47 = vadd.f32 %v1952_v44, %v4437_v37  ;;  %v2831_v44 = vld [vmem:[%s4835_s29 + $0x40] sm:$0xff] }
 0xec9   : > { %v1787_v48 = vsel %vm1036_vm3, %v1786_v46, -inf }
 0xeca   : > { %1788 = vmax.xlane.f32.xlu0 %v1787_v48  ;;  %v1954_v49 = vsel %vm1036_vm3, %v1953_v47, -inf  ;;  %v2834_v48 = vld [vmem:[%s4835_s29 + $0x58] sm:$0xff] }
 0xecb   : > { %1955 = vmax.xlane.f32.xlu1 %v1954_v49 }
 0xedc   : > { %1798 = vrot.lane.b32.xlu1 %v1705_v34, %s4839_s0  ;;  %s3735_s0 = scalar_lea.vmem %s4686_s5, 16 }
 0xedd   : > { %p3736_p3 = scmp.ne.s32.totalorder %s4686_s5, %s3735_s0 }
 0xedf   : > { %p3737_p7 = pnand %p3736_p3, %p4846_p8 }
 0xee1   : > { %p3738_p12 = pneg %p3737_p7 }
 0xf57   : > { %v1789_v50 = vpop.xlane.xlu0 %1788 }
 0xf58   : > { %v1790_v51 = vsub.f32 %v1786_v46, %v1789_v50  ;;  %v1956_v52 = vpop.xlane.xlu1 %1955  ;;  %v3139_v46 = vpack.c.bf16 %v2832_v45, %v2831_v44  ;;  %v2835_v50 = vld [vmem:[%s4835_s29 + $0x60] sm:$0xff] }
 0xf59   : > { %v1957_v53 = vsub.f32 %v1953_v47, %v1956_v52  ;;  %v2833_v47 = vld [vmem:[%s4835_s29 + $0x50] sm:$0xff] }
 0xf5a   : > { %v1791_v54 = vmul.f32 1.442695, %v1790_v51  ;;  %v3142_v49 = vpack.c.bf16 %v2834_v48, %v2833_v47  ;;  %v2836_v51 = vld [vmem:[%s4835_s29 + $0x68] sm:$0xff] }
 0xf5b   : > { %v1958_v55 = vmul.f32 1.442695, %v1957_v53  ;;  %v3145_v52 = vpack.c.bf16 %v2836_v51, %v2835_v50  ;;  %v2837_v53 = vld [vmem:[%s4835_s29 + $0x70] sm:$0xff] }
 0xf5c   : > { %3351 = vpow2.f32 %v1791_v54  ;;  %v1799_v56 = vpop.permute.xlu1 %1798  ;;  %v2838_v54 = vld [vmem:[%s4835_s29 + $0x78] sm:$0xff] }
 0xf5d   : > { %3013 = vmatpush3.msra.mxu1 %v1799_v56  ;;  %3353 = vpow2.f32 %v1958_v55  ;;  %v3148_v55 = vpack.c.bf16 %v2838_v54, %v2837_v53  ;;  %v2829_v56 = vld [vmem:[#allocation16 + $0x1] ss:$0 sm:$0xff] }
 0xf5e   : > { %3022 = vmatprep.subr.mxu1 %v3848_v13 }
 0xf66   : > { %v3352_v37 = vpop.eup %3351 }
 0xf67   : > { %v1793_v57 = vsel %vm1036_vm3, %v3352_v37, 0.0  ;;  %v3354_v58 = vpop.eup %3353 }
 0xf68   : > { %1794 = vadd.xlane.f32.xlu0 %v1793_v57  ;;  %v1960_v59 = vsel %vm1036_vm3, %v3354_v58, 0.0 }
 0xf6c   : > { %1961 = vadd.xlane.f32.xlu0 %v1960_v59 }
 0xf82   : > { %1965 = vrot.lane.b32.xlu0 %v1705_v34, %s4840_s12  ;;  %s4841_s12 = smov 16  }
 0xff5   : > { %v1795_v60 = vpop.xlane.xlu0 %1794 }
 0xff6   : > { %3355 = vrcp.f32 %v1795_v60 }
 0xff9   : > { %v1962_v61 = vpop.xlane.xlu0 %1961 }
 0xffa   : > { %3357 = vrcp.f32 %v1962_v61 }
 0xffd   : > { %v1966_v0 = vpop.permute.xlu0 %1965 }
0x1000   : > { %v3356_v62 = vpop.eup %3355 }
0x1001   : > { %v1797_v63 = vmul.f32 %v3356_v62, %v3352_v37 }
0x1003   : > { %3015 = vmatmul.mubr.msk.f32.vlgmr.msra.gmra.mrb[12].mxu1 %vm1036_vm3, %v1797_v63 }
0x1004   : > { %v3358_v1 = vpop.eup %3357  ;;  %3023 = vmatpush3.msra.mxu1 %v1966_v0  ;;  %3024 = vmatprep.mubr.msk.f32.mxu1 %vm3847_vm1, %v3848_v13 }
0x1005   : > { %v1964_v2 = vmul.f32 %v3358_v1, %v3354_v58  ;;  %3132 = vmatprep.subr.bf16.mxu1 %v3846_v10 }
0x1007   : > { %3025 = vmatmul.mubr.msk.f32.vlgmr.msra.gmra.mrb[14].mxu1 %vm1036_vm3, %v1964_v2 }
0x1008   : > { %3046 = vmatprep.mubr.msk.f32.mxu1 %vm3847_vm1, %v3848_v13  ;;  %3134 = vmatpush3.bf16.msra.mxu1 %v3133_v23 }
0x1009   : > { %3135 = vmatprep.subr.bf16.mxu1 %v3846_v10 }
0x10d6   : > { %v1870_v9 = vpop.f32.mrb[12].mxu1 }
0x10d7   : > { %v3016_v11 = vpop.f32.mrb[13].mxu1 }
0x10da   : > { %v2037_v12 = vpop.f32.mrb[14].mxu1 }
0x10db   : > { %2042 = vrot.lane.b32.xlu1 %v2037_v12, %s4841_s12  ;;  %v3026_v14 = vpop.f32.mrb[15].mxu1  ;;  %s4842_s12 = sld [smem:[#allocation48_spill]] }
0x114d   : > { %v2043_v15 = vpop.permute.xlu1 %2042 }
0x114e   : > { %v2045_v16 = vsel %vm953_vm2, %v1870_v9, %v2043_v15 }
0x114f   : > { %3036 = vmatmul.mubr.msk.f32.vlgmr.msra.gmra.mrb[10].mxu0 %vm834_vm0, %v2045_v16 }
0x1150   : > { %3065 = vmatprep.mubr.msk.f32.mxu0 %vm3847_vm1, %v3848_v13  ;;  %3140 = vmatpush3.bf16.msra.mxu0 %v3139_v46 }
0x1151   : > { %3141 = vmatprep.subr.bf16.mxu0 %v3846_v10 }
0x1154   : > { %3143 = vmatpush3.bf16.msra.mxu0 %v3142_v49 }
0x1155   : > { %3144 = vmatprep.subr.bf16.mxu0 %v3846_v10 }
0x1158   : > { %3146 = vmatpush3.bf16.msra.mxu0 %v3145_v52 }
0x1159   : > { %3147 = vmatprep.subr.bf16.mxu0 %v3846_v10 }
0x115c   : > { %3149 = vmatpush3.bf16.msra.mxu0 %v3148_v55 }
0x1222   : > { %v2128_v18 = vpop.f32.mrb[10].mxu0 }
0x1223   : > { %v2129_v19 = vadd.f32 %v2821_v17, %v2128_v18  ;;  %v3037_v20 = vpop.f32.mrb[11].mxu0  ;;  %v2381_v17 = vld [vmem:[%s4842_s12] sm:$0xff]  ;;  %v2382_v18 = vld [vmem:[%s4842_s12 + $0x8] sm:$0xff] }
0x1224   : > { %v2383_v20 = vld [vmem:[%s4842_s12 + $0x10] sm:$0xff] }
0x1225   : > { %v2132_v21 = vadd.f32 %v2129_v19, %v4541_v31  ;;  %v2827_v31 = vld [vmem:[%s4834_s10 + $0x30] sm:$0xff]  ;;  %v3151_v19 = vpack.c.bf16 %v2382_v18, %v2381_v17  ;;  %s4845_s10 = sld [smem:[#allocation51_spill]] }
0x1226   : > { %v3136_v33 = vpack.c.bf16 %v2828_v32, %v2827_v31  ;;  %v2466_v32 = vld [vmem:[%s4843_s18] sm:$0xff] }
0x1227   : > { %v2137_v22 = vsel %vm834_vm0, %v2132_v21, 0.0 }
0x1228   : > { %2138 = vadd.xlane.f32.xlu1 %v2137_v22  ;;  %3137 = vmatpush3.bf16.msra.mxu1 %v3136_v33  ;;  %v2467_v33 = vld [vmem:[%s4843_s18 + $0x8] sm:$0xff] }
0x1229   : > { %3150 = vmatprep.subr.bf16.mxu1 %v3846_v10 }
0x122b   : > { %s4684_s11 = scalar_lea.hbm %s4845_s10, %s2847_s9 }
0x12b5   : > { %v2139_v24 = vpop.xlane.xlu1 %2138 }
0x12b6   : > { %v2140_v25 = vmul.f32 0.03125, %v2139_v24 }
0x12b8   : > { %v2141_v26 = vsub.f32 %v2132_v21, %v2140_v25  ;;  %v2384_v21 = vld [vmem:[%s4842_s12 + $0x18] sm:$0xff] }
0x12b9   : > { %v3154_v22 = vpack.c.bf16 %v2384_v21, %v2383_v20 }
0x12ba   : > { %v2142_v27 = vmul.f32 %v2141_v26, %v2141_v26 }
0x12bc   : > { %v2143_v28 = vsel %vm834_vm0, %v2142_v27, 0.0 }
0x12bd   : > { %2144 = vadd.xlane.f32.xlu0 %v2143_v28  ;;  %v2841_v28 = vld [vmem:[#allocation19 + $0x1] ss:$0 sm:$0xff] }
0x134a   : > { %v2145_v34 = vpop.xlane.xlu0 %2144 }
0x134b   : > { %v2146_v35 = vmul.f32 0.03125, %v2145_v34  ;;  %v2468_v34 = vld [vmem:[%s4843_s18 + $0x10] sm:$0xff] }
0x134d   : > { %v2147_v36 = vadd.f32 1e-12, %v2146_v35  ;;  %v3157_v35 = vpack.c.bf16 %v2467_v33, %v2466_v32 }
0x134f   : > { %3359 = vrsqrt.f32 %v2147_v36  ;;  %v2469_v36 = vld [vmem:[%s4843_s18 + $0x18] sm:$0xff] }
0x1359   : > { %v3360_v38 = vpop.eup %3359 }
0x135a   : > { %v2149_v40 = vmul.f32 %v3360_v38, %v2141_v26  ;;  %v2843_v38 = vld [vmem:[#allocation22] ss:$0 sm:$0xff] }
0x135c   : > { %v2156_v42 = vmul.f32 %v2823_v39, %v2149_v40 }
0x135e   : > { %v2163_v43 = vadd.f32 %v2824_v41, %v2156_v42 }
0x1360   : > { %3047 = vmatmul.mubr.msk.f32.vlgmr.msra.gmra.mrb[16].mxu1 %vm834_vm0, %v2163_v43 }
0x1361   : > { %3076 = vmatprep.mubr.msk.f32.mxu1 %vm3847_vm1, %v3848_v13  ;;  %3152 = vmatpush3.bf16.msra.mxu1 %v3151_v19 }
0x1362   : > { %3153 = vmatprep.subr.bf16.mxu1 %v3846_v10 }
0x1365   : > { %3155 = vmatpush3.bf16.msra.mxu1 %v3154_v22 }
0x1366   : > { %3156 = vmatprep.subr.bf16.mxu1 %v3846_v10 }
0x1433   : > { %v2246_v37 = vpop.f32.mrb[16].mxu1 }
0x1434   : > { %v2247_v57 = vadd.f32 %v2829_v56, %v2246_v37  ;;  %v3048_v58 = vpop.f32.mrb[17].mxu1 }
0x1436   : > { %v2251_v59 = vmul.f32 0.044715, %v2247_v57  ;;  %v2250_v1 = vmul.f32 0.5, %v2247_v57 }
0x1438   : > { %v2252_v60 = vmul.f32 %v2251_v59, %v2247_v57 }
0x143a   : > { %v2253_v61 = vmul.f32 %v2252_v60, %v2247_v57 }
0x143c   : > { %v2254_v62 = vadd.f32 %v2253_v61, %v2247_v57 }
0x143e   : > { %v2255_v63 = vmul.f32 0.7978846, %v2254_v62 }
0x1440   : > { %3361 = vtanh.f32 %v2255_v63 }
0x144a   : > { %v3362_v0 = vpop.eup %3361 }
0x144b   : > { %v2257_v2 = vadd.f32 1.0, %v3362_v0 }
0x144d   : > { %v2258_v3 = vmul.f32 %v2257_v2, %v2250_v1 }
0x144f   : > { %3066 = vmatmul.mubr.msk.f32.vlgmr.msra.gmra.mrb[12].mxu0 %vm1518_vm4, %v2258_v3 }
0x1522   : > { %v2345_v5 = vpop.f32.mrb[12].mxu0 }
0x1523   : > { %v2346_v6 = vadd.f32 %v2839_v4, %v2345_v5  ;;  %v3067_v7 = vpop.f32.mrb[13].mxu0 }
0x1525   : > { %v2349_v8 = vadd.f32 %v2346_v6, %v2163_v43  ;;  %v2845_v43 = vld [vmem:[%s4844_s16] ss:$0 sm:$0xff]  ;;  %s3739_s16 = sshll.u32 %s3855_s27, 4  ;;  %s3740_s16 = int_to_ptr.vmem [resolvable:$false] %s3739_s16 }
0x1526   : > { %s3741_s12 = scalar_lea.vmem %s3740_s16, 32  ;;  %p3742_p10 = scmp.lt.s32.totalorder %s4686_s5, %s3740_s16 }
0x1527   : > { %v2354_v9 = vsel %vm834_vm0, %v2349_v8, 0.0  ;;  %p3743_p4 = scmp.lt.s32.totalorder %s3741_s12, %s3735_s0 }
0x1528   : > { %2355 = vadd.xlane.f32.xlu0 %v2354_v9 }
0x1529   : > { %p3744_p1 = por %p3743_p4, %p3742_p10 }
0x152b   : > { %p3745_p13 = pnand %p3744_p1, %p3738_p12 }
0x15b5   : > { %v2356_v11 = vpop.xlane.xlu0 %2355 }
0x15b6   : > { %v2357_v12 = vmul.f32 0.03125, %v2356_v11 }
0x15b8   : > { %v2358_v14 = vsub.f32 %v2349_v8, %v2357_v12 }
0x15ba   : > { %v2359_v15 = vmul.f32 %v2358_v14, %v2358_v14 }
0x15bc   : > { %v2360_v16 = vsel %vm834_vm0, %v2359_v15, 0.0 }
0x15bd   : > { %2361 = vadd.xlane.f32.xlu1 %v2360_v16 }
0x164a   : > { %v2362_v24 = vpop.xlane.xlu1 %2361 }
0x164b   : > { %v2363_v25 = vmul.f32 0.03125, %v2362_v24 }
0x164d   : > { %v2364_v26 = vadd.f32 1e-12, %v2363_v25 }
0x164f   : > { %3363 = vrsqrt.f32 %v2364_v26 }
0x1659   : > { %v3364_v27 = vpop.eup %3363 }
0x165a   : > { %v2366_v29 = vmul.f32 %v3364_v27, %v2358_v14 }
0x165c   : > { %v2373_v23 = vmul.f32 %v2841_v28, %v2366_v29 }
0x165e   : > { %v2380_v31 = vadd.f32 %v2842_v30, %v2373_v23 }
0x1660   : > { %3077 = vmatmul.mubr.msk.f32.vlgmr.msra.gmra.mrb[18].mxu1 %vm834_vm0, %v2380_v31 }
0x1661   : > { %3087 = vmatprep.mubr.msk.f32.mxu1 %vm3847_vm1, %v3848_v13  ;;  %3158 = vmatpush3.bf16.msra.mxu1 %v3157_v35  ;;  %v3160_v13 = vpack.c.bf16 %v2469_v36, %v2468_v34 }
0x1662   : > { %3159 = vmatprep.subr.bf16.mxu1 %v3846_v10 }
0x1665   : > { %3161 = vmatpush3.bf16.msra.mxu1 %v3160_v13 }
0x1733   : > { %v2461_v39 = vpop.f32.mrb[18].mxu1 }
0x1734   : > { %v2462_v40 = vadd.f32 %v2843_v38, %v2461_v39  ;;  %v3078_v41 = vpop.f32.mrb[19].mxu1 }
0x1736   : > { %3365 = vtanh.f32 %v2462_v40 }
0x1740   : > { %v3366_v42 = vpop.eup %3365 }
0x1741   : > { %3088 = vmatmul.mubr.msk.f32.vlgmr.msra.gmra.mrb[20].mxu1 %vm834_vm0, %v3366_v42 }
0x1814   : > { %v2546_v44 = vpop.f32.mrb[20].mxu1 }
0x1815   : > { %v2547_v10 = vadd.f32 %v2845_v43, %v2546_v44  ;;  %v3089_v45 = vpop.f32.mrb[21].mxu1 }
0x1817   : > { %2551 = vst.msk [vmem:[%s830_s8] sm:$0x1] %vm2550_vm5, %v2547_v10 }
0x1818   : > { %3748 = shalt.err (!%p3745_p13)
}
0x1819   : > { %s3749_s6 = scalar_lea.hbm %s4684_s11, 16  ;;  %s3753_s3 = scalar_lea.hbm %s4845_s10, 32 }
0x181a   : > { %p3750_p0 = scmp.ne.s32.totalorder %s4684_s11, %s3749_s6  ;;  %p3754_p11 = scmp.lt.u32.totalorder %s4684_s11, %s4845_s10 }
0x181b   : > { %p3755_p5 = scmp.lt.u32.totalorder %s3753_s3, %s3749_s6  ;;  %p3757_p3 = scmp.lt.u32.totalorder %s3749_s6, %s4684_s11 }
0x181c   : > { %p3751_p2 = pnand %p3750_p0, %p4846_p8 }
0x181d   : > { %p3756_p9 = por %p3755_p5, %p3754_p11 }
0x181e   : > { %p3752_p6 = pneg %p3751_p2 }
0x181f   : > { %p3758_p7 = por %p3757_p3, %p3756_p9 }
0x1821   : > { %p3759_p12 = pnand %p3758_p7, %p3752_p6 }
0x1823   : > { %3762 = shalt.err (!%p3759_p12)
}
0x1824   : > { %3210 = dma.vmem_to_hbm [thread:$0]  (%p4846_p8), %s4686_s5, 16, %s4684_s11, %s2553_s30  }
0x1825 PF: > { %s2577_s12 = sand.u32 1, %s3817_s1   ;;  %p4847_p10 = scmp.ne.s32.totalorder %s4811_s28, 0 }
0x1826   : > { %p4848_p4 = scmp.ge.s32.totalorder %s3829_s24, 2  ;;  %s2578_s0 = scalar_lea.sflag [#allocation4], %s2577_s12 }
0x1828   : > { %p3254_p1 = pnand %p4848_p4, %p4847_p10 }
0x182a   : > { %3812 = dma.done.wait (!%p3254_p1), %s2578_s0, 16  }
0x182b   : > { %3814 = vsyncadd (!%p3254_p1), %s2578_s0, 4294967280  ;;  %p41_p13 = scmp.ge.s32.totalorder %s4253_s4, 4   ;;  %s4849_s1 = smov %s3821_s22 }
0x182c   : > { %s4850_s22 = smov %s3825_s23  ;;  %s4851_s23 = smov %s4265_s19 }
0x182d   : > { %s4852_s24 = smov %s4253_s4  ;;  %43 = sbr.rel (!%p41_p13) target bundleno = 30 (0x1e), region = 214 }
0x1834   :  { %2582 = vsyncpa [#allocation3], 1 }
0x1835   :  { %2584 = vsyncpa [#allocation3 + $0x1], 1 }
0x1836   :  { %2585 = vsyncpa [#allocation6], 1 }
0x1837   :  { %2587 = vsyncpa [#allocation6 + $0x1], 1 }
0x1838   :  { %2588 = vsyncpa [#allocation9], 1 }
0x1839   :  { %2589 = vsyncpa [#allocation12], 1 }
0x183a   :  { %2590 = vsyncpa [#allocation15], 1 }
0x183b   :  { %2591 = vsyncpa [#allocation18], 1 }
0x183c   :  { %2592 = vsyncpa [#allocation21], 1 }
0x183d   :  { %2593 = vsyncpa [#allocation4], 1 }
0x183e   :  { %2595 = vsyncpa [#allocation4 + $0x1], 1 }

</bundles_post_ra>
